<compile_context>
chip_gen: v7x
topology: tpu7x:2x2x1
jax: 0.10.0
libtpu: 0.0.40
codegen_flags: <defaults>
</compile_context>

<pallas_src>
import functools

import jax
import jax.numpy as jnp
from jax.experimental import pallas as pl
from jax.experimental.pallas import tpu as pltpu

# ---------------- config (Encoder.__init__ hyper-parameters) ----------------
D_EMB = 64
D_FF = D_EMB * 4
N_HEAD = D_EMB // 64            # = 1
D_HEAD = D_EMB // N_HEAD
D_DATA_FEAT = 16
N_NODE_VARS = 2                 # max_node_vars_n
N_EDGE_VARS = 2                 # max_edge_vars_n
N_TRANSFORMER_LAYERS = 2
N_GNN_LAYERS = 2
MAX_SAMPLE_NUM = 8
SPLIT = True
DROPOUT = 0.0                   # inference: dropout is identity


def _round_up(x, m):
    return ((x + m - 1) // m) * m


# ---------------- in-kernel helpers ----------------
def _mm(a, b):
    """MXU matmul: bf16 operands, f32 accumulation."""
    return jnp.dot(a.astype(jnp.bfloat16), b.astype(jnp.bfloat16),
                   preferred_element_type=jnp.float32)


def _mm_t(a, b):
    """a^T @ b (contract dim 0 with dim 0), bf16 operands, f32 accumulation."""
    return jax.lax.dot_general(a.astype(jnp.bfloat16), b.astype(jnp.bfloat16),
                               (((0,), (0,)), ((), ())),
                               preferred_element_type=jnp.float32)


def _qkt(q, k):
    """q @ k^T (contract last dims), bf16 operands, f32 accumulation."""
    return jax.lax.dot_general(q.astype(jnp.bfloat16), k.astype(jnp.bfloat16),
                               (((1,), (1,)), ((), ())),
                               preferred_element_type=jnp.float32)


def _layer_norm(x, g, b, eps=1e-5):
    mu = jnp.mean(x, axis=-1, keepdims=True)
    var = jnp.mean((x - mu) ** 2, axis=-1, keepdims=True)
    return (x - mu) * jax.lax.rsqrt(var + eps) * g + b


# ====================================================================
# Single fused kernel: GNN (all samples) -> gather -> transformer.
# ====================================================================
def _encoder_kernel(v_ref, e_ref, ssrc_ref, sdst_ref, adj_ref, sel_ref,
                    nenc_w_ref, nenc_b_ref, eenc_w_ref, eenc_b_ref,
                    ew_ref, eb_ref, nw_ref, nb_ref,
                    wqkv_ref, bqkv_ref, wo_ref, bo_ref,
                    ln1g_ref, ln1b_ref, w1_ref, b1_ref, w2_ref, b2_ref,
                    ln2g_ref, ln2b_ref,
                    o_ref, *, seq_len, root_is_node, scale):
    # -------- GNN: all N samples stacked along rows, block-diag structure -----
    ssrc = ssrc_ref[...]                 # (E_tp, V_tp) block-diag one-hot src selector
    sdst = sdst_ref[...]                 # (E_tp, V_tp) block-diag one-hot dst selector
    adj = adj_ref[...]                   # (V_tp, V_tp) block-diag adjacency

    v = jnp.maximum(_mm(v_ref[...], nenc_w_ref[...]) + nenc_b_ref[...], 0.0)  # (V_tp, D)
    e = jnp.maximum(_mm(e_ref[...], eenc_w_ref[...]) + eenc_b_ref[...], 0.0)  # (E_tp, D)

    for l in range(N_GNN_LAYERS):        # unrolled; weights stay resident in VMEM
        we = ew_ref[l]                   # (3D, D) bf16
        be = eb_ref[l]                   # (1, D)  f32
        wv = nw_ref[l]                   # (3D, D) bf16
        bv = nb_ref[l]                   # (1, D)  f32

        # gather node embeddings at edge endpoints (one-hot matmul on the MXU)
        h_src = _mm(ssrc, v)             # (E_tp, D)
        h_dst = _mm(sdst, v)             # (E_tp, D)

        # edge update: concat([h_src, h_dst, e]) @ we  ==  partial dots (no concat)
        e_new = jnp.maximum(
            _mm(h_src, we[:D_EMB]) + _mm(h_dst, we[D_EMB:2 * D_EMB])
            + _mm(e, we[2 * D_EMB:]) + be, 0.0)

        # scatter-add of edge messages to dst nodes: S_dst^T @ e_new
        agg = _mm_t(sdst, e_new)         # (V_tp, D)
        adj_agg = _mm(adj, v)            # (V_tp, D)

        # node update: concat([v, agg, adj_agg]) @ wv  ==  partial dots
        v = jnp.maximum(
            _mm(v, wv[:D_EMB]) + _mm(agg, wv[D_EMB:2 * D_EMB])
            + _mm(adj_agg, wv[2 * D_EMB:]) + bv, 0.0)
        e = e_new

    # -------- subsample / permutation gather (one-hot selection matmul) -------
    x = _mm(sel_ref[...], v if root_is_node else e)        # (S_pad, D) f32

    # -------- transformer encoder: L layers unrolled, post-LN, n_head == 1 ----
    s_pad = x.shape[0]
    for l in range(N_TRANSFORMER_LAYERS):
        # fused QKV projection: one lane-dense 192-wide MXU pass
        qkv = _mm(x, wqkv_ref[l]) + bqkv_ref[l]             # (S_pad, 3D)
        q = qkv[:, :D_EMB]
        k = qkv[:, D_EMB:2 * D_EMB]
        vv = qkv[:, 2 * D_EMB:]

        s = _qkt(q, k) * scale                              # (S_pad, S_pad)
        if seq_len < s_pad:                                 # mask padded key rows
            col = jax.lax.broadcasted_iota(jnp.int32, s.shape, 1)
            s = jnp.where(col < seq_len, s, -1e30)
        m = jnp.max(s, axis=-1, keepdims=True)
        p = jnp.exp(s - m)
        p = p / jnp.sum(p, axis=-1, keepdims=True)          # exact softmax (parity)
        attn = _mm(p, vv)
        attn = _mm(attn, wo_ref[l]) + bo_ref[l]

        x = _layer_norm(x + attn, ln1g_ref[l], ln1b_ref[l])
        ff = jnp.maximum(_mm(x, w1_ref[l]) + b1_ref[l], 0.0)
        ff = _mm(ff, w2_ref[l]) + b2_ref[l]
        x = _layer_norm(x + ff, ln2g_ref[l], ln2b_ref[l])

    o_ref[...] = x                                          # single writeback


# ---------------- parameters (bf16 weights, f32 biases / LN params) ----------
def init_params(key):
    d_node_in = N_NODE_VARS * D_DATA_FEAT
    d_edge_in = N_EDGE_VARS * D_DATA_FEAT
    keys = iter(jax.random.split(key, 16))

    def w(shape, scale=0.02):
        return (scale * jax.random.normal(next(keys), shape, jnp.float32)
                ).astype(jnp.bfloat16)

    gnn = {
        'node_enc_w': w((d_node_in, D_EMB)),
        'node_enc_b': jnp.zeros((1, D_EMB), jnp.float32),
        'edge_enc_w': w((d_edge_in, D_EMB)),
        'edge_enc_b': jnp.zeros((1, D_EMB), jnp.float32),
        'edge_w': w((N_GNN_LAYERS, 3 * D_EMB, D_EMB)),
        'edge_b': jnp.zeros((N_GNN_LAYERS, 1, D_EMB), jnp.float32),
        'node_w': w((N_GNN_LAYERS, 3 * D_EMB, D_EMB)),
        'node_b': jnp.zeros((N_GNN_LAYERS, 1, D_EMB), jnp.float32),
    }
    L = N_TRANSFORMER_LAYERS
    tf = {
        'wqkv': w((L, D_EMB, 3 * D_EMB)),
        'bqkv': jnp.zeros((L, 1, 3 * D_EMB), jnp.float32),
        'wo': w((L, D_EMB, D_EMB)),
        'bo': jnp.zeros((L, 1, D_EMB), jnp.float32),
        'ln1_g': jnp.ones((L, 1, D_EMB), jnp.float32),
        'ln1_b': jnp.zeros((L, 1, D_EMB), jnp.float32),
        'w1': w((L, D_EMB, D_FF)),
        'b1': jnp.zeros((L, 1, D_FF), jnp.float32),
        'w2': w((L, D_FF, D_EMB)),
        'b2': jnp.zeros((L, 1, D_EMB), jnp.float32),
        'ln2_g': jnp.ones((L, 1, D_EMB), jnp.float32),
        'ln2_b': jnp.zeros((L, 1, D_EMB), jnp.float32),
    }
    return {'gnn': gnn, 'tf': tf}


# ---------------- forward pass: layout prep in JAX, ONE pallas_call ----------
def encoder_forward(params, v_bits, e_bits, G, A, root_type='node', mask=None,
                    perm_key=None):
    N, V, nv, _ = v_bits.shape
    _, E, ne, _ = e_bits.shape

    # F.pad on the vars dim, then flatten(-2, -1)
    v_bits = jnp.pad(v_bits, ((0, 0), (0, 0), (0, N_NODE_VARS - nv), (0, 0)))
    e_bits = jnp.pad(e_bits, ((0, 0), (0, 0), (0, N_EDGE_VARS - ne), (0, 0)))

    # Fold the per-sample GNN loop: stack all samples along the row dim and pad
    # the stacked row dims to bf16-friendly multiples of 16 (zero rows are inert:
    # padded selector rows/cols are zero and padded rows are never selected).
    V_tot, E_tot = N * V, N * E
    V_tp, E_tp = _round_up(V_tot, 16), _round_up(E_tot, 16)

    v_in = jnp.pad(v_bits.reshape(V_tot, N_NODE_VARS * D_DATA_FEAT).astype(jnp.float32),
                   ((0, V_tp - V_tot), (0, 0))).astype(jnp.bfloat16)
    e_in = jnp.pad(e_bits.reshape(E_tot, N_EDGE_VARS * D_DATA_FEAT).astype(jnp.float32),
                   ((0, E_tp - E_tot), (0, 0))).astype(jnp.bfloat16)

    # Shared-per-sample graph structure -> block-diagonal stacked selectors.
    eye = jnp.eye(N, dtype=jnp.float32)
    s_src = jax.nn.one_hot(G[:, 0], V, dtype=jnp.float32)            # (E, V)
    s_dst = jax.nn.one_hot(G[:, 1], V, dtype=jnp.float32)
    S_src = jnp.pad(jnp.kron(eye, s_src),
                    ((0, E_tp - E_tot), (0, V_tp - V_tot))).astype(jnp.bfloat16)
    S_dst = jnp.pad(jnp.kron(eye, s_dst),
                    ((0, E_tp - E_tot), (0, V_tp - V_tot))).astype(jnp.bfloat16)
    A_blk = jnp.pad(jnp.kron(eye, A.astype(jnp.float32)),
                    ((0, V_tp - V_tot), (0, V_tp - V_tot))).astype(jnp.bfloat16)

    if mask is not None:
        # TODO(synk): boolean-mask sampling yields data-dependent shapes; only mask=None supported.
        raise NotImplementedError("mask != None not supported in this kernel port")

    # torch.randperm subsampling -> deterministic JAX permutation, realized
    # in-kernel as a one-hot gather matmul (no second kernel / HBM round-trip).
    total = V_tot if root_type == 'node' else E_tot
    width = V_tp if root_type == 'node' else E_tp
    if total > MAX_SAMPLE_NUM:
        perm_key = jax.random.PRNGKey(1) if perm_key is None else perm_key
        sel = jax.random.permutation(perm_key, total)[:MAX_SAMPLE_NUM]
        seq_len = MAX_SAMPLE_NUM
    else:
        sel = jnp.arange(total)
        seq_len = total
    S_pad = _round_up(seq_len, 8)
    sel_mat = jnp.pad(jax.nn.one_hot(sel, width, dtype=jnp.float32),
                      ((0, S_pad - seq_len), (0, 0)))                # f32, tiny

    g, tf = params['gnn'], params['tf']
    kernel = functools.partial(_encoder_kernel, seq_len=seq_len,
                               root_is_node=(root_type == 'node'),
                               scale=1.0 / (D_HEAD ** 0.5))
    args = (v_in, e_in, S_src, S_dst, A_blk, sel_mat,
            g['node_enc_w'], g['node_enc_b'], g['edge_enc_w'], g['edge_enc_b'],
            g['edge_w'], g['edge_b'], g['node_w'], g['node_b'],
            tf['wqkv'], tf['bqkv'], tf['wo'], tf['bo'],
            tf['ln1_g'], tf['ln1_b'], tf['w1'], tf['b1'],
            tf['w2'], tf['b2'], tf['ln2_g'], tf['ln2_b'])

    out = pl.pallas_call(
        kernel,
        out_shape=jax.ShapeDtypeStruct((S_pad, D_EMB), jnp.float32),
        # Whole-array VMEM residency, single kernel invocation (no grid):
        # everything fits with huge headroom on v5e/v6e/v7x at these shapes.
        in_specs=[pl.BlockSpec(memory_space=pltpu.MemorySpace.VMEM)] * len(args),
        out_specs=pl.BlockSpec(memory_space=pltpu.MemorySpace.VMEM),
    )(*args)
    return out[:seq_len]


encoder_forward_jit = jax.jit(encoder_forward, static_argnames=('root_type',))


# ---------------- demo ----------------
if __name__ == "__main__":
    key = jax.random.PRNGKey(0)
    kp, kv, ke = jax.random.split(key, 3)
    params = init_params(kp)

    N, V, E = 2, 4, 6
    # v_bits has 1 var (< max_node_vars_n=2) to exercise the padding path
    v_bits = (jax.random.uniform(kv, (N, V, 1, D_DATA_FEAT)) > 0.5).astype(jnp.float32)
    e_bits = (jax.random.uniform(ke, (N, E, 2, D_DATA_FEAT)) > 0.5).astype(jnp.float32)
    G = jnp.array([[0, 1], [1, 2], [2, 3], [3, 0], [0, 2], [1, 3]], dtype=jnp.int32)
    A = jnp.zeros((V, V), dtype=jnp.int32).at[G[:, 0], G[:, 1]].set(1)
    A = A | A.T

    out = encoder_forward_jit(params, v_bits, e_bits, G, A, root_type='node')
    out = jax.block_until_ready(out)
    assert out.shape == (MAX_SAMPLE_NUM, D_EMB) and out.dtype == jnp.float32
    assert bool(jnp.all(jnp.isfinite(out)))
    print("KERNEL_OK")
</pallas_src>

<mosaic_0001>
module attributes {stable_mosaic.version = 11 : i64} {
  func.func @_encoder_kernel(%arg0: memref<16x32xbf16, #tpu.memory_space<vmem>>, %arg1: memref<16x32xbf16, #tpu.memory_space<vmem>>, %arg2: memref<16x16xbf16, #tpu.memory_space<vmem>>, %arg3: memref<16x16xbf16, #tpu.memory_space<vmem>>, %arg4: memref<16x16xbf16, #tpu.memory_space<vmem>>, %arg5: memref<8x16xf32, #tpu.memory_space<vmem>>, %arg6: memref<32x64xbf16, #tpu.memory_space<vmem>>, %arg7: memref<1x64xf32, #tpu.memory_space<vmem>>, %arg8: memref<32x64xbf16, #tpu.memory_space<vmem>>, %arg9: memref<1x64xf32, #tpu.memory_space<vmem>>, %arg10: memref<2x192x64xbf16, #tpu.memory_space<vmem>>, %arg11: memref<2x1x64xf32, #tpu.memory_space<vmem>>, %arg12: memref<2x192x64xbf16, #tpu.memory_space<vmem>>, %arg13: memref<2x1x64xf32, #tpu.memory_space<vmem>>, %arg14: memref<2x64x192xbf16, #tpu.memory_space<vmem>>, %arg15: memref<2x1x192xf32, #tpu.memory_space<vmem>>, %arg16: memref<2x64x64xbf16, #tpu.memory_space<vmem>>, %arg17: memref<2x1x64xf32, #tpu.memory_space<vmem>>, %arg18: memref<2x1x64xf32, #tpu.memory_space<vmem>>, %arg19: memref<2x1x64xf32, #tpu.memory_space<vmem>>, %arg20: memref<2x64x256xbf16, #tpu.memory_space<vmem>>, %arg21: memref<2x1x256xf32, #tpu.memory_space<vmem>>, %arg22: memref<2x256x64xbf16, #tpu.memory_space<vmem>>, %arg23: memref<2x1x64xf32, #tpu.memory_space<vmem>>, %arg24: memref<2x1x64xf32, #tpu.memory_space<vmem>>, %arg25: memref<2x1x64xf32, #tpu.memory_space<vmem>>, %arg26: memref<8x64xf32, #tpu.memory_space<vmem>>) attributes {dimension_semantics = [], scalar_prefetch = 0 : i64, scratch_operands = 0 : i64, tpu.core_type = #tpu.core_type<tc>} {
    %c0 = arith.constant 0 : index
    %c0_0 = arith.constant 0 : index
    %0 = vector.load %arg2[%c0, %c0_0] : memref<16x16xbf16, #tpu.memory_space<vmem>>, vector<16x16xbf16>
    %c0_1 = arith.constant 0 : index
    %c0_2 = arith.constant 0 : index
    %1 = vector.load %arg3[%c0_1, %c0_2] : memref<16x16xbf16, #tpu.memory_space<vmem>>, vector<16x16xbf16>
    %c0_3 = arith.constant 0 : index
    %c0_4 = arith.constant 0 : index
    %2 = vector.load %arg4[%c0_3, %c0_4] : memref<16x16xbf16, #tpu.memory_space<vmem>>, vector<16x16xbf16>
    %c0_5 = arith.constant 0 : index
    %c0_6 = arith.constant 0 : index
    %3 = vector.load %arg0[%c0_5, %c0_6] : memref<16x32xbf16, #tpu.memory_space<vmem>>, vector<16x32xbf16>
    %c0_7 = arith.constant 0 : index
    %c0_8 = arith.constant 0 : index
    %4 = vector.load %arg6[%c0_7, %c0_8] : memref<32x64xbf16, #tpu.memory_space<vmem>>, vector<32x64xbf16>
    %cst = arith.constant dense<0.000000e+00> : vector<16x64xf32>
    %5 = tpu.matmul %3, %4, %cst {dimension_numbers = #tpu.dot_dimension_numbers<[1], [0], [0], [1], [0, 0, 1, 1], [], []>} : vector<16x32xbf16>, vector<32x64xbf16>, vector<16x64xf32> -> vector<16x64xf32>
    %c0_9 = arith.constant 0 : index
    %c0_10 = arith.constant 0 : index
    %6 = vector.load %arg7[%c0_9, %c0_10] : memref<1x64xf32, #tpu.memory_space<vmem>>, vector<1x64xf32>
    %7 = vector.broadcast %6 : vector<1x64xf32> to vector<16x64xf32>
    %8 = arith.addf %5, %7 : vector<16x64xf32>
    %cst_11 = arith.constant 0.000000e+00 : f32
    %9 = vector.broadcast %cst_11 : f32 to vector<16x64xf32>
    %10 = arith.maximumf %8, %9 : vector<16x64xf32>
    %c0_12 = arith.constant 0 : index
    %c0_13 = arith.constant 0 : index
    %11 = vector.load %arg1[%c0_12, %c0_13] : memref<16x32xbf16, #tpu.memory_space<vmem>>, vector<16x32xbf16>
    %c0_14 = arith.constant 0 : index
    %c0_15 = arith.constant 0 : index
    %12 = vector.load %arg8[%c0_14, %c0_15] : memref<32x64xbf16, #tpu.memory_space<vmem>>, vector<32x64xbf16>
    %cst_16 = arith.constant dense<0.000000e+00> : vector<16x64xf32>
    %13 = tpu.matmul %11, %12, %cst_16 {dimension_numbers = #tpu.dot_dimension_numbers<[1], [0], [0], [1], [0, 0, 1, 1], [], []>} : vector<16x32xbf16>, vector<32x64xbf16>, vector<16x64xf32> -> vector<16x64xf32>
    %c0_17 = arith.constant 0 : index
    %c0_18 = arith.constant 0 : index
    %14 = vector.load %arg9[%c0_17, %c0_18] : memref<1x64xf32, #tpu.memory_space<vmem>>, vector<1x64xf32>
    %15 = vector.broadcast %14 : vector<1x64xf32> to vector<16x64xf32>
    %16 = arith.addf %13, %15 : vector<16x64xf32>
    %cst_19 = arith.constant 0.000000e+00 : f32
    %17 = vector.broadcast %cst_19 : f32 to vector<16x64xf32>
    %18 = arith.maximumf %16, %17 : vector<16x64xf32>
    %c0_20 = arith.constant 0 : index
    %c0_21 = arith.constant 0 : index
    %c0_22 = arith.constant 0 : index
    %19 = vector.load %arg10[%c0_20, %c0_21, %c0_22] : memref<2x192x64xbf16, #tpu.memory_space<vmem>>, vector<1x192x64xbf16>
    %20 = vector.shape_cast %19 : vector<1x192x64xbf16> to vector<192x64xbf16>
    %c0_23 = arith.constant 0 : index
    %c0_24 = arith.constant 0 : index
    %c0_25 = arith.constant 0 : index
    %21 = vector.load %arg11[%c0_23, %c0_24, %c0_25] : memref<2x1x64xf32, #tpu.memory_space<vmem>>, vector<1x1x64xf32>
    %22 = vector.shape_cast %21 : vector<1x1x64xf32> to vector<1x64xf32>
    %c0_26 = arith.constant 0 : index
    %c0_27 = arith.constant 0 : index
    %c0_28 = arith.constant 0 : index
    %23 = vector.load %arg12[%c0_26, %c0_27, %c0_28] : memref<2x192x64xbf16, #tpu.memory_space<vmem>>, vector<1x192x64xbf16>
    %24 = vector.shape_cast %23 : vector<1x192x64xbf16> to vector<192x64xbf16>
    %c0_29 = arith.constant 0 : index
    %c0_30 = arith.constant 0 : index
    %c0_31 = arith.constant 0 : index
    %25 = vector.load %arg13[%c0_29, %c0_30, %c0_31] : memref<2x1x64xf32, #tpu.memory_space<vmem>>, vector<1x1x64xf32>
    %26 = vector.shape_cast %25 : vector<1x1x64xf32> to vector<1x64xf32>
    %27 = arith.truncf %10 : vector<16x64xf32> to vector<16x64xbf16>
    %cst_32 = arith.constant dense<0.000000e+00> : vector<16x64xf32>
    %28 = tpu.matmul %0, %27, %cst_32 {dimension_numbers = #tpu.dot_dimension_numbers<[1], [0], [0], [1], [0, 0, 1, 1], [], []>} : vector<16x16xbf16>, vector<16x64xbf16>, vector<16x64xf32> -> vector<16x64xf32>
    %29 = arith.truncf %10 : vector<16x64xf32> to vector<16x64xbf16>
    %cst_33 = arith.constant dense<0.000000e+00> : vector<16x64xf32>
    %30 = tpu.matmul %1, %29, %cst_33 {dimension_numbers = #tpu.dot_dimension_numbers<[1], [0], [0], [1], [0, 0, 1, 1], [], []>} : vector<16x16xbf16>, vector<16x64xbf16>, vector<16x64xf32> -> vector<16x64xf32>
    %31 = vector.extract_strided_slice %20 {offsets = [0, 0], sizes = [64, 64], strides = [1, 1]} : vector<192x64xbf16> to vector<64x64xbf16>
    %32 = arith.truncf %28 : vector<16x64xf32> to vector<16x64xbf16>
    %cst_34 = arith.constant dense<0.000000e+00> : vector<16x64xf32>
    %33 = tpu.matmul %32, %31, %cst_34 {dimension_numbers = #tpu.dot_dimension_numbers<[1], [0], [0], [1], [0, 0, 1, 1], [], []>} : vector<16x64xbf16>, vector<64x64xbf16>, vector<16x64xf32> -> vector<16x64xf32>
    %34 = vector.extract_strided_slice %20 {offsets = [64, 0], sizes = [64, 64], strides = [1, 1]} : vector<192x64xbf16> to vector<64x64xbf16>
    %35 = arith.truncf %30 : vector<16x64xf32> to vector<16x64xbf16>
    %cst_35 = arith.constant dense<0.000000e+00> : vector<16x64xf32>
    %36 = tpu.matmul %35, %34, %cst_35 {dimension_numbers = #tpu.dot_dimension_numbers<[1], [0], [0], [1], [0, 0, 1, 1], [], []>} : vector<16x64xbf16>, vector<64x64xbf16>, vector<16x64xf32> -> vector<16x64xf32>
    %37 = arith.addf %33, %36 : vector<16x64xf32>
    %38 = vector.extract_strided_slice %20 {offsets = [128, 0], sizes = [64, 64], strides = [1, 1]} : vector<192x64xbf16> to vector<64x64xbf16>
    %39 = arith.truncf %18 : vector<16x64xf32> to vector<16x64xbf16>
    %cst_36 = arith.constant dense<0.000000e+00> : vector<16x64xf32>
    %40 = tpu.matmul %39, %38, %cst_36 {dimension_numbers = #tpu.dot_dimension_numbers<[1], [0], [0], [1], [0, 0, 1, 1], [], []>} : vector<16x64xbf16>, vector<64x64xbf16>, vector<16x64xf32> -> vector<16x64xf32>
    %41 = arith.addf %37, %40 : vector<16x64xf32>
    %42 = vector.broadcast %22 : vector<1x64xf32> to vector<16x64xf32>
    %43 = arith.addf %41, %42 : vector<16x64xf32>
    %cst_37 = arith.constant 0.000000e+00 : f32
    %44 = vector.broadcast %cst_37 : f32 to vector<16x64xf32>
    %45 = arith.maximumf %43, %44 : vector<16x64xf32>
    %46 = arith.truncf %45 : vector<16x64xf32> to vector<16x64xbf16>
    %cst_38 = arith.constant dense<0.000000e+00> : vector<16x64xf32>
    %47 = tpu.matmul %1, %46, %cst_38 {dimension_numbers = #tpu.dot_dimension_numbers<[0], [0], [1], [1], [0, 1, 1, 1], [], []>} : vector<16x16xbf16>, vector<16x64xbf16>, vector<16x64xf32> -> vector<16x64xf32>
    %48 = arith.truncf %10 : vector<16x64xf32> to vector<16x64xbf16>
    %cst_39 = arith.constant dense<0.000000e+00> : vector<16x64xf32>
    %49 = tpu.matmul %2, %48, %cst_39 {dimension_numbers = #tpu.dot_dimension_numbers<[1], [0], [0], [1], [0, 0, 1, 1], [], []>} : vector<16x16xbf16>, vector<16x64xbf16>, vector<16x64xf32> -> vector<16x64xf32>
    %50 = vector.extract_strided_slice %24 {offsets = [0, 0], sizes = [64, 64], strides = [1, 1]} : vector<192x64xbf16> to vector<64x64xbf16>
    %51 = arith.truncf %10 : vector<16x64xf32> to vector<16x64xbf16>
    %cst_40 = arith.constant dense<0.000000e+00> : vector<16x64xf32>
    %52 = tpu.matmul %51, %50, %cst_40 {dimension_numbers = #tpu.dot_dimension_numbers<[1], [0], [0], [1], [0, 0, 1, 1], [], []>} : vector<16x64xbf16>, vector<64x64xbf16>, vector<16x64xf32> -> vector<16x64xf32>
    %53 = vector.extract_strided_slice %24 {offsets = [64, 0], sizes = [64, 64], strides = [1, 1]} : vector<192x64xbf16> to vector<64x64xbf16>
    %54 = arith.truncf %47 : vector<16x64xf32> to vector<16x64xbf16>
    %cst_41 = arith.constant dense<0.000000e+00> : vector<16x64xf32>
    %55 = tpu.matmul %54, %53, %cst_41 {dimension_numbers = #tpu.dot_dimension_numbers<[1], [0], [0], [1], [0, 0, 1, 1], [], []>} : vector<16x64xbf16>, vector<64x64xbf16>, vector<16x64xf32> -> vector<16x64xf32>
    %56 = arith.addf %52, %55 : vector<16x64xf32>
    %57 = vector.extract_strided_slice %24 {offsets = [128, 0], sizes = [64, 64], strides = [1, 1]} : vector<192x64xbf16> to vector<64x64xbf16>
    %58 = arith.truncf %49 : vector<16x64xf32> to vector<16x64xbf16>
    %cst_42 = arith.constant dense<0.000000e+00> : vector<16x64xf32>
    %59 = tpu.matmul %58, %57, %cst_42 {dimension_numbers = #tpu.dot_dimension_numbers<[1], [0], [0], [1], [0, 0, 1, 1], [], []>} : vector<16x64xbf16>, vector<64x64xbf16>, vector<16x64xf32> -> vector<16x64xf32>
    %60 = arith.addf %56, %59 : vector<16x64xf32>
    %61 = vector.broadcast %26 : vector<1x64xf32> to vector<16x64xf32>
    %62 = arith.addf %60, %61 : vector<16x64xf32>
    %cst_43 = arith.constant 0.000000e+00 : f32
    %63 = vector.broadcast %cst_43 : f32 to vector<16x64xf32>
    %64 = arith.maximumf %62, %63 : vector<16x64xf32>
    %c1 = arith.constant 1 : index
    %c0_44 = arith.constant 0 : index
    %c0_45 = arith.constant 0 : index
    %65 = vector.load %arg10[%c1, %c0_44, %c0_45] : memref<2x192x64xbf16, #tpu.memory_space<vmem>>, vector<1x192x64xbf16>
    %66 = vector.shape_cast %65 : vector<1x192x64xbf16> to vector<192x64xbf16>
    %c1_46 = arith.constant 1 : index
    %c0_47 = arith.constant 0 : index
    %c0_48 = arith.constant 0 : index
    %67 = vector.load %arg11[%c1_46, %c0_47, %c0_48] : memref<2x1x64xf32, #tpu.memory_space<vmem>>, vector<1x1x64xf32>
    %68 = vector.shape_cast %67 : vector<1x1x64xf32> to vector<1x64xf32>
    %c1_49 = arith.constant 1 : index
    %c0_50 = arith.constant 0 : index
    %c0_51 = arith.constant 0 : index
    %69 = vector.load %arg12[%c1_49, %c0_50, %c0_51] : memref<2x192x64xbf16, #tpu.memory_space<vmem>>, vector<1x192x64xbf16>
    %70 = vector.shape_cast %69 : vector<1x192x64xbf16> to vector<192x64xbf16>
    %c1_52 = arith.constant 1 : index
    %c0_53 = arith.constant 0 : index
    %c0_54 = arith.constant 0 : index
    %71 = vector.load %arg13[%c1_52, %c0_53, %c0_54] : memref<2x1x64xf32, #tpu.memory_space<vmem>>, vector<1x1x64xf32>
    %72 = vector.shape_cast %71 : vector<1x1x64xf32> to vector<1x64xf32>
    %73 = arith.truncf %64 : vector<16x64xf32> to vector<16x64xbf16>
    %cst_55 = arith.constant dense<0.000000e+00> : vector<16x64xf32>
    %74 = tpu.matmul %0, %73, %cst_55 {dimension_numbers = #tpu.dot_dimension_numbers<[1], [0], [0], [1], [0, 0, 1, 1], [], []>} : vector<16x16xbf16>, vector<16x64xbf16>, vector<16x64xf32> -> vector<16x64xf32>
    %75 = arith.truncf %64 : vector<16x64xf32> to vector<16x64xbf16>
    %cst_56 = arith.constant dense<0.000000e+00> : vector<16x64xf32>
    %76 = tpu.matmul %1, %75, %cst_56 {dimension_numbers = #tpu.dot_dimension_numbers<[1], [0], [0], [1], [0, 0, 1, 1], [], []>} : vector<16x16xbf16>, vector<16x64xbf16>, vector<16x64xf32> -> vector<16x64xf32>
    %77 = vector.extract_strided_slice %66 {offsets = [0, 0], sizes = [64, 64], strides = [1, 1]} : vector<192x64xbf16> to vector<64x64xbf16>
    %78 = arith.truncf %74 : vector<16x64xf32> to vector<16x64xbf16>
    %cst_57 = arith.constant dense<0.000000e+00> : vector<16x64xf32>
    %79 = tpu.matmul %78, %77, %cst_57 {dimension_numbers = #tpu.dot_dimension_numbers<[1], [0], [0], [1], [0, 0, 1, 1], [], []>} : vector<16x64xbf16>, vector<64x64xbf16>, vector<16x64xf32> -> vector<16x64xf32>
    %80 = vector.extract_strided_slice %66 {offsets = [64, 0], sizes = [64, 64], strides = [1, 1]} : vector<192x64xbf16> to vector<64x64xbf16>
    %81 = arith.truncf %76 : vector<16x64xf32> to vector<16x64xbf16>
    %cst_58 = arith.constant dense<0.000000e+00> : vector<16x64xf32>
    %82 = tpu.matmul %81, %80, %cst_58 {dimension_numbers = #tpu.dot_dimension_numbers<[1], [0], [0], [1], [0, 0, 1, 1], [], []>} : vector<16x64xbf16>, vector<64x64xbf16>, vector<16x64xf32> -> vector<16x64xf32>
    %83 = arith.addf %79, %82 : vector<16x64xf32>
    %84 = vector.extract_strided_slice %66 {offsets = [128, 0], sizes = [64, 64], strides = [1, 1]} : vector<192x64xbf16> to vector<64x64xbf16>
    %85 = arith.truncf %45 : vector<16x64xf32> to vector<16x64xbf16>
    %cst_59 = arith.constant dense<0.000000e+00> : vector<16x64xf32>
    %86 = tpu.matmul %85, %84, %cst_59 {dimension_numbers = #tpu.dot_dimension_numbers<[1], [0], [0], [1], [0, 0, 1, 1], [], []>} : vector<16x64xbf16>, vector<64x64xbf16>, vector<16x64xf32> -> vector<16x64xf32>
    %87 = arith.addf %83, %86 : vector<16x64xf32>
    %88 = vector.broadcast %68 : vector<1x64xf32> to vector<16x64xf32>
    %89 = arith.addf %87, %88 : vector<16x64xf32>
    %cst_60 = arith.constant 0.000000e+00 : f32
    %90 = vector.broadcast %cst_60 : f32 to vector<16x64xf32>
    %91 = arith.maximumf %89, %90 : vector<16x64xf32>
    %92 = arith.truncf %91 : vector<16x64xf32> to vector<16x64xbf16>
    %cst_61 = arith.constant dense<0.000000e+00> : vector<16x64xf32>
    %93 = tpu.matmul %1, %92, %cst_61 {dimension_numbers = #tpu.dot_dimension_numbers<[0], [0], [1], [1], [0, 1, 1, 1], [], []>} : vector<16x16xbf16>, vector<16x64xbf16>, vector<16x64xf32> -> vector<16x64xf32>
    %94 = arith.truncf %64 : vector<16x64xf32> to vector<16x64xbf16>
    %cst_62 = arith.constant dense<0.000000e+00> : vector<16x64xf32>
    %95 = tpu.matmul %2, %94, %cst_62 {dimension_numbers = #tpu.dot_dimension_numbers<[1], [0], [0], [1], [0, 0, 1, 1], [], []>} : vector<16x16xbf16>, vector<16x64xbf16>, vector<16x64xf32> -> vector<16x64xf32>
    %96 = vector.extract_strided_slice %70 {offsets = [0, 0], sizes = [64, 64], strides = [1, 1]} : vector<192x64xbf16> to vector<64x64xbf16>
    %97 = arith.truncf %64 : vector<16x64xf32> to vector<16x64xbf16>
    %cst_63 = arith.constant dense<0.000000e+00> : vector<16x64xf32>
    %98 = tpu.matmul %97, %96, %cst_63 {dimension_numbers = #tpu.dot_dimension_numbers<[1], [0], [0], [1], [0, 0, 1, 1], [], []>} : vector<16x64xbf16>, vector<64x64xbf16>, vector<16x64xf32> -> vector<16x64xf32>
    %99 = vector.extract_strided_slice %70 {offsets = [64, 0], sizes = [64, 64], strides = [1, 1]} : vector<192x64xbf16> to vector<64x64xbf16>
    %100 = arith.truncf %93 : vector<16x64xf32> to vector<16x64xbf16>
    %cst_64 = arith.constant dense<0.000000e+00> : vector<16x64xf32>
    %101 = tpu.matmul %100, %99, %cst_64 {dimension_numbers = #tpu.dot_dimension_numbers<[1], [0], [0], [1], [0, 0, 1, 1], [], []>} : vector<16x64xbf16>, vector<64x64xbf16>, vector<16x64xf32> -> vector<16x64xf32>
    %102 = arith.addf %98, %101 : vector<16x64xf32>
    %103 = vector.extract_strided_slice %70 {offsets = [128, 0], sizes = [64, 64], strides = [1, 1]} : vector<192x64xbf16> to vector<64x64xbf16>
    %104 = arith.truncf %95 : vector<16x64xf32> to vector<16x64xbf16>
    %cst_65 = arith.constant dense<0.000000e+00> : vector<16x64xf32>
    %105 = tpu.matmul %104, %103, %cst_65 {dimension_numbers = #tpu.dot_dimension_numbers<[1], [0], [0], [1], [0, 0, 1, 1], [], []>} : vector<16x64xbf16>, vector<64x64xbf16>, vector<16x64xf32> -> vector<16x64xf32>
    %106 = arith.addf %102, %105 : vector<16x64xf32>
    %107 = vector.broadcast %72 : vector<1x64xf32> to vector<16x64xf32>
    %108 = arith.addf %106, %107 : vector<16x64xf32>
    %cst_66 = arith.constant 0.000000e+00 : f32
    %109 = vector.broadcast %cst_66 : f32 to vector<16x64xf32>
    %110 = arith.maximumf %108, %109 : vector<16x64xf32>
    %c0_67 = arith.constant 0 : index
    %c0_68 = arith.constant 0 : index
    %111 = vector.load %arg5[%c0_67, %c0_68] : memref<8x16xf32, #tpu.memory_space<vmem>>, vector<8x16xf32>
    %112 = arith.truncf %111 : vector<8x16xf32> to vector<8x16xbf16>
    %113 = arith.truncf %110 : vector<16x64xf32> to vector<16x64xbf16>
    %cst_69 = arith.constant dense<0.000000e+00> : vector<8x64xf32>
    %114 = tpu.matmul %112, %113, %cst_69 {dimension_numbers = #tpu.dot_dimension_numbers<[1], [0], [0], [1], [0, 0, 1, 1], [], []>} : vector<8x16xbf16>, vector<16x64xbf16>, vector<8x64xf32> -> vector<8x64xf32>
    %c0_70 = arith.constant 0 : index
    %c0_71 = arith.constant 0 : index
    %c0_72 = arith.constant 0 : index
    %115 = vector.load %arg14[%c0_70, %c0_71, %c0_72] : memref<2x64x192xbf16, #tpu.memory_space<vmem>>, vector<1x64x192xbf16>
    %116 = vector.shape_cast %115 : vector<1x64x192xbf16> to vector<64x192xbf16>
    %117 = arith.truncf %114 : vector<8x64xf32> to vector<8x64xbf16>
    %cst_73 = arith.constant dense<0.000000e+00> : vector<8x192xf32>
    %118 = tpu.matmul %117, %116, %cst_73 {dimension_numbers = #tpu.dot_dimension_numbers<[1], [0], [0], [1], [0, 0, 1, 1], [], []>} : vector<8x64xbf16>, vector<64x192xbf16>, vector<8x192xf32> -> vector<8x192xf32>
    %c0_74 = arith.constant 0 : index
    %c0_75 = arith.constant 0 : index
    %c0_76 = arith.constant 0 : index
    %119 = vector.load %arg15[%c0_74, %c0_75, %c0_76] : memref<2x1x192xf32, #tpu.memory_space<vmem>>, vector<1x1x192xf32>
    %120 = vector.shape_cast %119 : vector<1x1x192xf32> to vector<1x192xf32>
    %121 = vector.broadcast %120 : vector<1x192xf32> to vector<8x192xf32>
    %122 = arith.addf %118, %121 : vector<8x192xf32>
    %123 = vector.extract_strided_slice %122 {offsets = [0, 0], sizes = [8, 64], strides = [1, 1]} : vector<8x192xf32> to vector<8x64xf32>
    %124 = vector.extract_strided_slice %122 {offsets = [0, 64], sizes = [8, 64], strides = [1, 1]} : vector<8x192xf32> to vector<8x64xf32>
    %125 = vector.extract_strided_slice %122 {offsets = [0, 128], sizes = [8, 64], strides = [1, 1]} : vector<8x192xf32> to vector<8x64xf32>
    %126 = arith.truncf %123 : vector<8x64xf32> to vector<8x64xbf16>
    %127 = arith.truncf %124 : vector<8x64xf32> to vector<8x64xbf16>
    %cst_77 = arith.constant dense<0.000000e+00> : vector<8x8xf32>
    %128 = tpu.matmul %126, %127, %cst_77 {dimension_numbers = #tpu.dot_dimension_numbers<[1], [1], [0], [0], [0, 0, 1, 0], [], []>} : vector<8x64xbf16>, vector<8x64xbf16>, vector<8x8xf32> -> vector<8x8xf32>
    %cst_78 = arith.constant 1.250000e-01 : f32
    %129 = vector.broadcast %cst_78 : f32 to vector<8x8xf32>
    %130 = arith.mulf %128, %129 : vector<8x8xf32>
    %cst_79 = arith.constant dense<0xFF800000> : vector<8xf32>
    %131 = vector.multi_reduction <maximumf>, %130, %cst_79 [1] : vector<8x8xf32> to vector<8xf32>
    %132 = vector.shape_cast %131 : vector<8xf32> to vector<8x1xf32>
    %133 = vector.broadcast %132 : vector<8x1xf32> to vector<8x8xf32>
    %134 = arith.subf %130, %133 : vector<8x8xf32>
    %135 = math.exp %134 : vector<8x8xf32>
    %cst_80 = arith.constant dense<0.000000e+00> : vector<8xf32>
    %136 = vector.multi_reduction <add>, %135, %cst_80 [1] : vector<8x8xf32> to vector<8xf32>
    %137 = vector.shape_cast %136 : vector<8xf32> to vector<8x1xf32>
    %138 = vector.broadcast %137 : vector<8x1xf32> to vector<8x8xf32>
    %139 = arith.divf %135, %138 : vector<8x8xf32>
    %140 = arith.truncf %139 : vector<8x8xf32> to vector<8x8xbf16>
    %141 = arith.truncf %125 : vector<8x64xf32> to vector<8x64xbf16>
    %cst_81 = arith.constant dense<0.000000e+00> : vector<8x64xf32>
    %142 = tpu.matmul %140, %141, %cst_81 {dimension_numbers = #tpu.dot_dimension_numbers<[1], [0], [0], [1], [0, 0, 1, 1], [], []>} : vector<8x8xbf16>, vector<8x64xbf16>, vector<8x64xf32> -> vector<8x64xf32>
    %c0_82 = arith.constant 0 : index
    %c0_83 = arith.constant 0 : index
    %c0_84 = arith.constant 0 : index
    %143 = vector.load %arg16[%c0_82, %c0_83, %c0_84] : memref<2x64x64xbf16, #tpu.memory_space<vmem>>, vector<1x64x64xbf16>
    %144 = vector.shape_cast %143 : vector<1x64x64xbf16> to vector<64x64xbf16>
    %145 = arith.truncf %142 : vector<8x64xf32> to vector<8x64xbf16>
    %cst_85 = arith.constant dense<0.000000e+00> : vector<8x64xf32>
    %146 = tpu.matmul %145, %144, %cst_85 {dimension_numbers = #tpu.dot_dimension_numbers<[1], [0], [0], [1], [0, 0, 1, 1], [], []>} : vector<8x64xbf16>, vector<64x64xbf16>, vector<8x64xf32> -> vector<8x64xf32>
    %c0_86 = arith.constant 0 : index
    %c0_87 = arith.constant 0 : index
    %c0_88 = arith.constant 0 : index
    %147 = vector.load %arg17[%c0_86, %c0_87, %c0_88] : memref<2x1x64xf32, #tpu.memory_space<vmem>>, vector<1x1x64xf32>
    %148 = vector.shape_cast %147 : vector<1x1x64xf32> to vector<1x64xf32>
    %149 = vector.broadcast %148 : vector<1x64xf32> to vector<8x64xf32>
    %150 = arith.addf %146, %149 : vector<8x64xf32>
    %151 = arith.addf %114, %150 : vector<8x64xf32>
    %c0_89 = arith.constant 0 : index
    %c0_90 = arith.constant 0 : index
    %c0_91 = arith.constant 0 : index
    %152 = vector.load %arg18[%c0_89, %c0_90, %c0_91] : memref<2x1x64xf32, #tpu.memory_space<vmem>>, vector<1x1x64xf32>
    %153 = vector.shape_cast %152 : vector<1x1x64xf32> to vector<1x64xf32>
    %c0_92 = arith.constant 0 : index
    %c0_93 = arith.constant 0 : index
    %c0_94 = arith.constant 0 : index
    %154 = vector.load %arg19[%c0_92, %c0_93, %c0_94] : memref<2x1x64xf32, #tpu.memory_space<vmem>>, vector<1x1x64xf32>
    %155 = vector.shape_cast %154 : vector<1x1x64xf32> to vector<1x64xf32>
    %cst_95 = arith.constant dense<0.000000e+00> : vector<8xf32>
    %156 = vector.multi_reduction <add>, %151, %cst_95 [1] : vector<8x64xf32> to vector<8xf32>
    %157 = vector.shape_cast %156 : vector<8xf32> to vector<8x1xf32>
    %cst_96 = arith.constant 6.400000e+01 : f32
    %158 = vector.broadcast %cst_96 : f32 to vector<8x1xf32>
    %159 = arith.divf %157, %158 : vector<8x1xf32>
    %160 = vector.broadcast %159 : vector<8x1xf32> to vector<8x64xf32>
    %161 = arith.subf %151, %160 : vector<8x64xf32>
    %162 = arith.mulf %161, %161 : vector<8x64xf32>
    %cst_97 = arith.constant dense<0.000000e+00> : vector<8xf32>
    %163 = vector.multi_reduction <add>, %162, %cst_97 [1] : vector<8x64xf32> to vector<8xf32>
    %164 = vector.shape_cast %163 : vector<8xf32> to vector<8x1xf32>
    %cst_98 = arith.constant 6.400000e+01 : f32
    %165 = vector.broadcast %cst_98 : f32 to vector<8x1xf32>
    %166 = arith.divf %164, %165 : vector<8x1xf32>
    %167 = vector.broadcast %159 : vector<8x1xf32> to vector<8x64xf32>
    %168 = arith.subf %151, %167 : vector<8x64xf32>
    %cst_99 = arith.constant 9.99999974E-6 : f32
    %169 = vector.broadcast %cst_99 : f32 to vector<8x1xf32>
    %170 = arith.addf %166, %169 : vector<8x1xf32>
    %171 = math.rsqrt %170 : vector<8x1xf32>
    %172 = vector.broadcast %171 : vector<8x1xf32> to vector<8x64xf32>
    %173 = arith.mulf %168, %172 : vector<8x64xf32>
    %174 = vector.broadcast %153 : vector<1x64xf32> to vector<8x64xf32>
    %175 = arith.mulf %173, %174 : vector<8x64xf32>
    %176 = vector.broadcast %155 : vector<1x64xf32> to vector<8x64xf32>
    %177 = arith.addf %175, %176 : vector<8x64xf32>
    %c0_100 = arith.constant 0 : index
    %c0_101 = arith.constant 0 : index
    %c0_102 = arith.constant 0 : index
    %178 = vector.load %arg20[%c0_100, %c0_101, %c0_102] : memref<2x64x256xbf16, #tpu.memory_space<vmem>>, vector<1x64x256xbf16>
    %179 = vector.shape_cast %178 : vector<1x64x256xbf16> to vector<64x256xbf16>
    %180 = arith.truncf %177 : vector<8x64xf32> to vector<8x64xbf16>
    %cst_103 = arith.constant dense<0.000000e+00> : vector<8x256xf32>
    %181 = tpu.matmul %180, %179, %cst_103 {dimension_numbers = #tpu.dot_dimension_numbers<[1], [0], [0], [1], [0, 0, 1, 1], [], []>} : vector<8x64xbf16>, vector<64x256xbf16>, vector<8x256xf32> -> vector<8x256xf32>
    %c0_104 = arith.constant 0 : index
    %c0_105 = arith.constant 0 : index
    %c0_106 = arith.constant 0 : index
    %182 = vector.load %arg21[%c0_104, %c0_105, %c0_106] : memref<2x1x256xf32, #tpu.memory_space<vmem>>, vector<1x1x256xf32>
    %183 = vector.shape_cast %182 : vector<1x1x256xf32> to vector<1x256xf32>
    %184 = vector.broadcast %183 : vector<1x256xf32> to vector<8x256xf32>
    %185 = arith.addf %181, %184 : vector<8x256xf32>
    %cst_107 = arith.constant 0.000000e+00 : f32
    %186 = vector.broadcast %cst_107 : f32 to vector<8x256xf32>
    %187 = arith.maximumf %185, %186 : vector<8x256xf32>
    %c0_108 = arith.constant 0 : index
    %c0_109 = arith.constant 0 : index
    %c0_110 = arith.constant 0 : index
    %188 = vector.load %arg22[%c0_108, %c0_109, %c0_110] : memref<2x256x64xbf16, #tpu.memory_space<vmem>>, vector<1x256x64xbf16>
    %189 = vector.shape_cast %188 : vector<1x256x64xbf16> to vector<256x64xbf16>
    %190 = arith.truncf %187 : vector<8x256xf32> to vector<8x256xbf16>
    %cst_111 = arith.constant dense<0.000000e+00> : vector<8x64xf32>
    %191 = tpu.matmul %190, %189, %cst_111 {dimension_numbers = #tpu.dot_dimension_numbers<[1], [0], [0], [1], [0, 0, 1, 1], [], []>} : vector<8x256xbf16>, vector<256x64xbf16>, vector<8x64xf32> -> vector<8x64xf32>
    %c0_112 = arith.constant 0 : index
    %c0_113 = arith.constant 0 : index
    %c0_114 = arith.constant 0 : index
    %192 = vector.load %arg23[%c0_112, %c0_113, %c0_114] : memref<2x1x64xf32, #tpu.memory_space<vmem>>, vector<1x1x64xf32>
    %193 = vector.shape_cast %192 : vector<1x1x64xf32> to vector<1x64xf32>
    %194 = vector.broadcast %193 : vector<1x64xf32> to vector<8x64xf32>
    %195 = arith.addf %191, %194 : vector<8x64xf32>
    %196 = arith.addf %177, %195 : vector<8x64xf32>
    %c0_115 = arith.constant 0 : index
    %c0_116 = arith.constant 0 : index
    %c0_117 = arith.constant 0 : index
    %197 = vector.load %arg24[%c0_115, %c0_116, %c0_117] : memref<2x1x64xf32, #tpu.memory_space<vmem>>, vector<1x1x64xf32>
    %198 = vector.shape_cast %197 : vector<1x1x64xf32> to vector<1x64xf32>
    %c0_118 = arith.constant 0 : index
    %c0_119 = arith.constant 0 : index
    %c0_120 = arith.constant 0 : index
    %199 = vector.load %arg25[%c0_118, %c0_119, %c0_120] : memref<2x1x64xf32, #tpu.memory_space<vmem>>, vector<1x1x64xf32>
    %200 = vector.shape_cast %199 : vector<1x1x64xf32> to vector<1x64xf32>
    %cst_121 = arith.constant dense<0.000000e+00> : vector<8xf32>
    %201 = vector.multi_reduction <add>, %196, %cst_121 [1] : vector<8x64xf32> to vector<8xf32>
    %202 = vector.shape_cast %201 : vector<8xf32> to vector<8x1xf32>
    %cst_122 = arith.constant 6.400000e+01 : f32
    %203 = vector.broadcast %cst_122 : f32 to vector<8x1xf32>
    %204 = arith.divf %202, %203 : vector<8x1xf32>
    %205 = vector.broadcast %204 : vector<8x1xf32> to vector<8x64xf32>
    %206 = arith.subf %196, %205 : vector<8x64xf32>
    %207 = arith.mulf %206, %206 : vector<8x64xf32>
    %cst_123 = arith.constant dense<0.000000e+00> : vector<8xf32>
    %208 = vector.multi_reduction <add>, %207, %cst_123 [1] : vector<8x64xf32> to vector<8xf32>
    %209 = vector.shape_cast %208 : vector<8xf32> to vector<8x1xf32>
    %cst_124 = arith.constant 6.400000e+01 : f32
    %210 = vector.broadcast %cst_124 : f32 to vector<8x1xf32>
    %211 = arith.divf %209, %210 : vector<8x1xf32>
    %212 = vector.broadcast %204 : vector<8x1xf32> to vector<8x64xf32>
    %213 = arith.subf %196, %212 : vector<8x64xf32>
    %cst_125 = arith.constant 9.99999974E-6 : f32
    %214 = vector.broadcast %cst_125 : f32 to vector<8x1xf32>
    %215 = arith.addf %211, %214 : vector<8x1xf32>
    %216 = math.rsqrt %215 : vector<8x1xf32>
    %217 = vector.broadcast %216 : vector<8x1xf32> to vector<8x64xf32>
    %218 = arith.mulf %213, %217 : vector<8x64xf32>
    %219 = vector.broadcast %198 : vector<1x64xf32> to vector<8x64xf32>
    %220 = arith.mulf %218, %219 : vector<8x64xf32>
    %221 = vector.broadcast %200 : vector<1x64xf32> to vector<8x64xf32>
    %222 = arith.addf %220, %221 : vector<8x64xf32>
    %c1_126 = arith.constant 1 : index
    %c0_127 = arith.constant 0 : index
    %c0_128 = arith.constant 0 : index
    %223 = vector.load %arg14[%c1_126, %c0_127, %c0_128] : memref<2x64x192xbf16, #tpu.memory_space<vmem>>, vector<1x64x192xbf16>
    %224 = vector.shape_cast %223 : vector<1x64x192xbf16> to vector<64x192xbf16>
    %225 = arith.truncf %222 : vector<8x64xf32> to vector<8x64xbf16>
    %cst_129 = arith.constant dense<0.000000e+00> : vector<8x192xf32>
    %226 = tpu.matmul %225, %224, %cst_129 {dimension_numbers = #tpu.dot_dimension_numbers<[1], [0], [0], [1], [0, 0, 1, 1], [], []>} : vector<8x64xbf16>, vector<64x192xbf16>, vector<8x192xf32> -> vector<8x192xf32>
    %c1_130 = arith.constant 1 : index
    %c0_131 = arith.constant 0 : index
    %c0_132 = arith.constant 0 : index
    %227 = vector.load %arg15[%c1_130, %c0_131, %c0_132] : memref<2x1x192xf32, #tpu.memory_space<vmem>>, vector<1x1x192xf32>
    %228 = vector.shape_cast %227 : vector<1x1x192xf32> to vector<1x192xf32>
    %229 = vector.broadcast %228 : vector<1x192xf32> to vector<8x192xf32>
    %230 = arith.addf %226, %229 : vector<8x192xf32>
    %231 = vector.extract_strided_slice %230 {offsets = [0, 0], sizes = [8, 64], strides = [1, 1]} : vector<8x192xf32> to vector<8x64xf32>
    %232 = vector.extract_strided_slice %230 {offsets = [0, 64], sizes = [8, 64], strides = [1, 1]} : vector<8x192xf32> to vector<8x64xf32>
    %233 = vector.extract_strided_slice %230 {offsets = [0, 128], sizes = [8, 64], strides = [1, 1]} : vector<8x192xf32> to vector<8x64xf32>
    %234 = arith.truncf %231 : vector<8x64xf32> to vector<8x64xbf16>
    %235 = arith.truncf %232 : vector<8x64xf32> to vector<8x64xbf16>
    %cst_133 = arith.constant dense<0.000000e+00> : vector<8x8xf32>
    %236 = tpu.matmul %234, %235, %cst_133 {dimension_numbers = #tpu.dot_dimension_numbers<[1], [1], [0], [0], [0, 0, 1, 0], [], []>} : vector<8x64xbf16>, vector<8x64xbf16>, vector<8x8xf32> -> vector<8x8xf32>
    %cst_134 = arith.constant 1.250000e-01 : f32
    %237 = vector.broadcast %cst_134 : f32 to vector<8x8xf32>
    %238 = arith.mulf %236, %237 : vector<8x8xf32>
    %cst_135 = arith.constant dense<0xFF800000> : vector<8xf32>
    %239 = vector.multi_reduction <maximumf>, %238, %cst_135 [1] : vector<8x8xf32> to vector<8xf32>
    %240 = vector.shape_cast %239 : vector<8xf32> to vector<8x1xf32>
    %241 = vector.broadcast %240 : vector<8x1xf32> to vector<8x8xf32>
    %242 = arith.subf %238, %241 : vector<8x8xf32>
    %243 = math.exp %242 : vector<8x8xf32>
    %cst_136 = arith.constant dense<0.000000e+00> : vector<8xf32>
    %244 = vector.multi_reduction <add>, %243, %cst_136 [1] : vector<8x8xf32> to vector<8xf32>
    %245 = vector.shape_cast %244 : vector<8xf32> to vector<8x1xf32>
    %246 = vector.broadcast %245 : vector<8x1xf32> to vector<8x8xf32>
    %247 = arith.divf %243, %246 : vector<8x8xf32>
    %248 = arith.truncf %247 : vector<8x8xf32> to vector<8x8xbf16>
    %249 = arith.truncf %233 : vector<8x64xf32> to vector<8x64xbf16>
    %cst_137 = arith.constant dense<0.000000e+00> : vector<8x64xf32>
    %250 = tpu.matmul %248, %249, %cst_137 {dimension_numbers = #tpu.dot_dimension_numbers<[1], [0], [0], [1], [0, 0, 1, 1], [], []>} : vector<8x8xbf16>, vector<8x64xbf16>, vector<8x64xf32> -> vector<8x64xf32>
    %c1_138 = arith.constant 1 : index
    %c0_139 = arith.constant 0 : index
    %c0_140 = arith.constant 0 : index
    %251 = vector.load %arg16[%c1_138, %c0_139, %c0_140] : memref<2x64x64xbf16, #tpu.memory_space<vmem>>, vector<1x64x64xbf16>
    %252 = vector.shape_cast %251 : vector<1x64x64xbf16> to vector<64x64xbf16>
    %253 = arith.truncf %250 : vector<8x64xf32> to vector<8x64xbf16>
    %cst_141 = arith.constant dense<0.000000e+00> : vector<8x64xf32>
    %254 = tpu.matmul %253, %252, %cst_141 {dimension_numbers = #tpu.dot_dimension_numbers<[1], [0], [0], [1], [0, 0, 1, 1], [], []>} : vector<8x64xbf16>, vector<64x64xbf16>, vector<8x64xf32> -> vector<8x64xf32>
    %c1_142 = arith.constant 1 : index
    %c0_143 = arith.constant 0 : index
    %c0_144 = arith.constant 0 : index
    %255 = vector.load %arg17[%c1_142, %c0_143, %c0_144] : memref<2x1x64xf32, #tpu.memory_space<vmem>>, vector<1x1x64xf32>
    %256 = vector.shape_cast %255 : vector<1x1x64xf32> to vector<1x64xf32>
    %257 = vector.broadcast %256 : vector<1x64xf32> to vector<8x64xf32>
    %258 = arith.addf %254, %257 : vector<8x64xf32>
    %259 = arith.addf %222, %258 : vector<8x64xf32>
    %c1_145 = arith.constant 1 : index
    %c0_146 = arith.constant 0 : index
    %c0_147 = arith.constant 0 : index
    %260 = vector.load %arg18[%c1_145, %c0_146, %c0_147] : memref<2x1x64xf32, #tpu.memory_space<vmem>>, vector<1x1x64xf32>
    %261 = vector.shape_cast %260 : vector<1x1x64xf32> to vector<1x64xf32>
    %c1_148 = arith.constant 1 : index
    %c0_149 = arith.constant 0 : index
    %c0_150 = arith.constant 0 : index
    %262 = vector.load %arg19[%c1_148, %c0_149, %c0_150] : memref<2x1x64xf32, #tpu.memory_space<vmem>>, vector<1x1x64xf32>
    %263 = vector.shape_cast %262 : vector<1x1x64xf32> to vector<1x64xf32>
    %cst_151 = arith.constant dense<0.000000e+00> : vector<8xf32>
    %264 = vector.multi_reduction <add>, %259, %cst_151 [1] : vector<8x64xf32> to vector<8xf32>
    %265 = vector.shape_cast %264 : vector<8xf32> to vector<8x1xf32>
    %cst_152 = arith.constant 6.400000e+01 : f32
    %266 = vector.broadcast %cst_152 : f32 to vector<8x1xf32>
    %267 = arith.divf %265, %266 : vector<8x1xf32>
    %268 = vector.broadcast %267 : vector<8x1xf32> to vector<8x64xf32>
    %269 = arith.subf %259, %268 : vector<8x64xf32>
    %270 = arith.mulf %269, %269 : vector<8x64xf32>
    %cst_153 = arith.constant dense<0.000000e+00> : vector<8xf32>
    %271 = vector.multi_reduction <add>, %270, %cst_153 [1] : vector<8x64xf32> to vector<8xf32>
    %272 = vector.shape_cast %271 : vector<8xf32> to vector<8x1xf32>
    %cst_154 = arith.constant 6.400000e+01 : f32
    %273 = vector.broadcast %cst_154 : f32 to vector<8x1xf32>
    %274 = arith.divf %272, %273 : vector<8x1xf32>
    %275 = vector.broadcast %267 : vector<8x1xf32> to vector<8x64xf32>
    %276 = arith.subf %259, %275 : vector<8x64xf32>
    %cst_155 = arith.constant 9.99999974E-6 : f32
    %277 = vector.broadcast %cst_155 : f32 to vector<8x1xf32>
    %278 = arith.addf %274, %277 : vector<8x1xf32>
    %279 = math.rsqrt %278 : vector<8x1xf32>
    %280 = vector.broadcast %279 : vector<8x1xf32> to vector<8x64xf32>
    %281 = arith.mulf %276, %280 : vector<8x64xf32>
    %282 = vector.broadcast %261 : vector<1x64xf32> to vector<8x64xf32>
    %283 = arith.mulf %281, %282 : vector<8x64xf32>
    %284 = vector.broadcast %263 : vector<1x64xf32> to vector<8x64xf32>
    %285 = arith.addf %283, %284 : vector<8x64xf32>
    %c1_156 = arith.constant 1 : index
    %c0_157 = arith.constant 0 : index
    %c0_158 = arith.constant 0 : index
    %286 = vector.load %arg20[%c1_156, %c0_157, %c0_158] : memref<2x64x256xbf16, #tpu.memory_space<vmem>>, vector<1x64x256xbf16>
    %287 = vector.shape_cast %286 : vector<1x64x256xbf16> to vector<64x256xbf16>
    %288 = arith.truncf %285 : vector<8x64xf32> to vector<8x64xbf16>
    %cst_159 = arith.constant dense<0.000000e+00> : vector<8x256xf32>
    %289 = tpu.matmul %288, %287, %cst_159 {dimension_numbers = #tpu.dot_dimension_numbers<[1], [0], [0], [1], [0, 0, 1, 1], [], []>} : vector<8x64xbf16>, vector<64x256xbf16>, vector<8x256xf32> -> vector<8x256xf32>
    %c1_160 = arith.constant 1 : index
    %c0_161 = arith.constant 0 : index
    %c0_162 = arith.constant 0 : index
    %290 = vector.load %arg21[%c1_160, %c0_161, %c0_162] : memref<2x1x256xf32, #tpu.memory_space<vmem>>, vector<1x1x256xf32>
    %291 = vector.shape_cast %290 : vector<1x1x256xf32> to vector<1x256xf32>
    %292 = vector.broadcast %291 : vector<1x256xf32> to vector<8x256xf32>
    %293 = arith.addf %289, %292 : vector<8x256xf32>
    %cst_163 = arith.constant 0.000000e+00 : f32
    %294 = vector.broadcast %cst_163 : f32 to vector<8x256xf32>
    %295 = arith.maximumf %293, %294 : vector<8x256xf32>
    %c1_164 = arith.constant 1 : index
    %c0_165 = arith.constant 0 : index
    %c0_166 = arith.constant 0 : index
    %296 = vector.load %arg22[%c1_164, %c0_165, %c0_166] : memref<2x256x64xbf16, #tpu.memory_space<vmem>>, vector<1x256x64xbf16>
    %297 = vector.shape_cast %296 : vector<1x256x64xbf16> to vector<256x64xbf16>
    %298 = arith.truncf %295 : vector<8x256xf32> to vector<8x256xbf16>
    %cst_167 = arith.constant dense<0.000000e+00> : vector<8x64xf32>
    %299 = tpu.matmul %298, %297, %cst_167 {dimension_numbers = #tpu.dot_dimension_numbers<[1], [0], [0], [1], [0, 0, 1, 1], [], []>} : vector<8x256xbf16>, vector<256x64xbf16>, vector<8x64xf32> -> vector<8x64xf32>
    %c1_168 = arith.constant 1 : index
    %c0_169 = arith.constant 0 : index
    %c0_170 = arith.constant 0 : index
    %300 = vector.load %arg23[%c1_168, %c0_169, %c0_170] : memref<2x1x64xf32, #tpu.memory_space<vmem>>, vector<1x1x64xf32>
    %301 = vector.shape_cast %300 : vector<1x1x64xf32> to vector<1x64xf32>
    %302 = vector.broadcast %301 : vector<1x64xf32> to vector<8x64xf32>
    %303 = arith.addf %299, %302 : vector<8x64xf32>
    %304 = arith.addf %285, %303 : vector<8x64xf32>
    %c1_171 = arith.constant 1 : index
    %c0_172 = arith.constant 0 : index
    %c0_173 = arith.constant 0 : index
    %305 = vector.load %arg24[%c1_171, %c0_172, %c0_173] : memref<2x1x64xf32, #tpu.memory_space<vmem>>, vector<1x1x64xf32>
    %306 = vector.shape_cast %305 : vector<1x1x64xf32> to vector<1x64xf32>
    %c1_174 = arith.constant 1 : index
    %c0_175 = arith.constant 0 : index
    %c0_176 = arith.constant 0 : index
    %307 = vector.load %arg25[%c1_174, %c0_175, %c0_176] : memref<2x1x64xf32, #tpu.memory_space<vmem>>, vector<1x1x64xf32>
    %308 = vector.shape_cast %307 : vector<1x1x64xf32> to vector<1x64xf32>
    %cst_177 = arith.constant dense<0.000000e+00> : vector<8xf32>
    %309 = vector.multi_reduction <add>, %304, %cst_177 [1] : vector<8x64xf32> to vector<8xf32>
    %310 = vector.shape_cast %309 : vector<8xf32> to vector<8x1xf32>
    %cst_178 = arith.constant 6.400000e+01 : f32
    %311 = vector.broadcast %cst_178 : f32 to vector<8x1xf32>
    %312 = arith.divf %310, %311 : vector<8x1xf32>
    %313 = vector.broadcast %312 : vector<8x1xf32> to vector<8x64xf32>
    %314 = arith.subf %304, %313 : vector<8x64xf32>
    %315 = arith.mulf %314, %314 : vector<8x64xf32>
    %cst_179 = arith.constant dense<0.000000e+00> : vector<8xf32>
    %316 = vector.multi_reduction <add>, %315, %cst_179 [1] : vector<8x64xf32> to vector<8xf32>
    %317 = vector.shape_cast %316 : vector<8xf32> to vector<8x1xf32>
    %cst_180 = arith.constant 6.400000e+01 : f32
    %318 = vector.broadcast %cst_180 : f32 to vector<8x1xf32>
    %319 = arith.divf %317, %318 : vector<8x1xf32>
    %320 = vector.broadcast %312 : vector<8x1xf32> to vector<8x64xf32>
    %321 = arith.subf %304, %320 : vector<8x64xf32>
    %cst_181 = arith.constant 9.99999974E-6 : f32
    %322 = vector.broadcast %cst_181 : f32 to vector<8x1xf32>
    %323 = arith.addf %319, %322 : vector<8x1xf32>
    %324 = math.rsqrt %323 : vector<8x1xf32>
    %325 = vector.broadcast %324 : vector<8x1xf32> to vector<8x64xf32>
    %326 = arith.mulf %321, %325 : vector<8x64xf32>
    %327 = vector.broadcast %306 : vector<1x64xf32> to vector<8x64xf32>
    %328 = arith.mulf %326, %327 : vector<8x64xf32>
    %329 = vector.broadcast %308 : vector<1x64xf32> to vector<8x64xf32>
    %330 = arith.addf %328, %329 : vector<8x64xf32>
    %c0_182 = arith.constant 0 : index
    %c0_183 = arith.constant 0 : index
    %331 = vector.load %arg26[%c0_182, %c0_183] : memref<8x64xf32, #tpu.memory_space<vmem>>, vector<8x64xf32>
    tpu.vector_store %arg26[%c0_182, %c0_183], %330 {strides = array<i32>} : memref<8x64xf32, #tpu.memory_space<vmem>>, vector<8x64xf32>,
    return
  }
}

</mosaic_0001>

<bundles_post_ra>
// kernel: encoder_forward.1
= control target key start
LH: loop header
LB: loop body
LE: loop exit
PB: predicated region body
PF: predicated region fallthrough
CT: control target
= control target key end

     0   :  { %s4699_s0 = inlined_call_operand.vmem [shape: bf16[16,32], index: 0, kind: input, shape index: {}]   ;;  %s4700_s1 = inlined_call_operand.vmem [shape: bf16[16,32], index: 1, kind: input, shape index: {}]   ;;  %s4701_s2 = inlined_call_operand.vmem [shape: bf16[16,16], index: 2, kind: input, shape index: {}]   ;;  %s4702_s3 = inlined_call_operand.vmem [shape: bf16[16,16], index: 3, kind: input, shape index: {}]   ;;  %s4703_s4 = inlined_call_operand.vmem [shape: bf16[16,16], index: 4, kind: input, shape index: {}]   ;;  %s4704_s5 = inlined_call_operand.vmem [shape: f32[8,16], index: 5, kind: input, shape index: {}]   ;;  %s4705_s6 = inlined_call_operand.vmem [shape: bf16[32,64], index: 6, kind: input, shape index: {}]   ;;  %s4706_s7 = inlined_call_operand.vmem [shape: f32[1,64], index: 7, kind: input, shape index: {}]   ;;  %s4707_s8 = inlined_call_operand.vmem [shape: bf16[32,64], index: 8, kind: input, shape index: {}]   ;;  %s4708_s9 = inlined_call_operand.vmem [shape: f32[1,64], index: 9, kind: input, shape index: {}]   ;;  %s4709_s10 = inlined_call_operand.vmem [shape: bf16[2,192,64], index: 10, kind: input, shape index: {}]   ;;  %s4710_s11 = inlined_call_operand.vmem [shape: f32[2,1,64], index: 11, kind: input, shape index: {}]   ;;  %s4711_s12 = inlined_call_operand.vmem [shape: bf16[2,192,64], index: 12, kind: input, shape index: {}]   ;;  %s4712_s13 = inlined_call_operand.vmem [shape: f32[2,1,64], index: 13, kind: input, shape index: {}]   ;;  %s4713_s14 = inlined_call_operand.vmem [shape: bf16[2,64,192], index: 14, kind: input, shape index: {}]   ;;  %s4714_s15 = inlined_call_operand.vmem [shape: f32[2,1,192], index: 15, kind: input, shape index: {}]   ;;  %s4715_s16 = inlined_call_operand.vmem [shape: bf16[2,64,64], index: 16, kind: input, shape index: {}]   ;;  %s4716_s17 = inlined_call_operand.vmem [shape: f32[2,1,64], index: 17, kind: input, shape index: {}]   ;;  %s4717_s18 = inlined_call_operand.vmem [shape: f32[2,1,64], index: 18, kind: input, shape index: {}]   ;;  %s4718_s19 = inlined_call_operand.vmem [shape: f32[2,1,64], index: 19, kind: input, shape index: {}]   ;;  %s4719_s20 = inlined_call_operand.vmem [shape: bf16[2,64,256], index: 20, kind: input, shape index: {}]   ;;  %s4720_s21 = inlined_call_operand.vmem [shape: f32[2,1,256], index: 21, kind: input, shape index: {}]   ;;  %s4721_s22 = inlined_call_operand.vmem [shape: bf16[2,256,64], index: 22, kind: input, shape index: {}]   ;;  %s4722_s23 = inlined_call_operand.vmem [shape: f32[2,1,64], index: 23, kind: input, shape index: {}]   ;;  %s4723_s24 = inlined_call_operand.vmem [shape: f32[2,1,64], index: 24, kind: input, shape index: {}]   ;;  %s4724_s25 = inlined_call_operand.vmem [shape: f32[2,1,64], index: 25, kind: input, shape index: {}]   ;;  %s4725_s26 = inlined_call_operand.hbm [shape: f32[8,64], index: 26, kind: output, shape index: {}]  }
   0x1   :  { %4729 = sst [smem:[#allocation5_spill]] %s4699_s0 }
   0x2   :  { %4730 = sst [smem:[#allocation6_spill]] %s4700_s1 }
   0x3   :  { %4731 = sst [smem:[#allocation7_spill]] %s4701_s2 }
   0x4   :  { %4732 = sst [smem:[#allocation8_spill]] %s4702_s3 }
   0x5   :  { %4733 = sst [smem:[#allocation9_spill]] %s4703_s4 }
   0x6   :  { %4734 = sst [smem:[#allocation10_spill]] %s4704_s5 }
   0x7   :  { %4735 = sst [smem:[#allocation11_spill]] %s4705_s6 }
   0x8   :  { %4736 = sst [smem:[#allocation12_spill]] %s4706_s7 }
   0x9   :  { %4737 = sst [smem:[#allocation13_spill]] %s4707_s8 }
   0xa   :  { %4738 = sst [smem:[#allocation14_spill]] %s4708_s9 }
   0xb   :  { %4739 = sst [smem:[#allocation15_spill]] %s4709_s10 }
   0xc   :  { %s4740_s7 = sld [smem:[#allocation11_spill]]  ;;  %v3851_v1 = vmov 0.0   ;;  %vm3852_vm0 = vmmov 0   ;;  %s4741_s0 = sld [smem:[#allocation5_spill]]  ;;  %vm121_vm1 = vcmask 261120  }
   0xd   :  { %3399 = vmatprep.subr.bf16.mxu0 %v3851_v1  ;;  %3421 = vmatprep.subr.bf16.mxu1 %v3851_v1  ;;  %s4742_s2 = sld [smem:[#allocation13_spill]] }
   0xe   :  { %3403 = vmatprep.mubr.msk.bf16.mxu0 %vm3852_vm0, %v3851_v1  ;;  %3423 = vmatprep.mubr.msk.bf16.mxu1 %vm3852_vm0, %v3851_v1 }
  0x12   :  { %v3666_v0 = vld [vmem:[%s4740_s7] sm:$0xff]   ;;  %v3667_v2 = vld [vmem:[%s4740_s7 + $0x8] sm:$0xff]  }
  0x13   :  { %3400 = vmatpush3.bf16.msra.mxu0 %v3666_v0  ;;  %v3668_v3 = vld [vmem:[%s4741_s0] sm:$0xff]  }
  0x14   :  { %3401 = vmatprep.subr.bf16.mxu0 %v3851_v1  ;;  %v3669_v4 = vld [vmem:[%s4742_s2] sm:$0xff]  }
  0x17   :  { %3402 = vmatpush3.bf16.msra.mxu0 %v3667_v2 }
  0x18   :  { %3407 = vmatprep.subr.bf16.mxu0 %v3851_v1 }
  0x1a   :  { %3404 = vmatmul.mubr.msk.bf16.vlgmr.msra.gmra.mrb[0].mxu0 %vm121_vm1, %v3668_v3 }
  0x1b   :  { %3408 = vmatpush3.bf16.msra.mxu0 %v3669_v4  ;;  %3411 = vmatprep.mubr.msk.bf16.mxu0 %vm3852_vm0, %v3851_v1 }
  0x1c   :  { %3409 = vmatprep.subr.bf16.mxu0 %v3851_v1 }
  0x1d   :  { %31 = vsyncpa [#allocation3], 0  ;;  %v3670_v5 = vld [vmem:[%s4742_s2 + $0x8] sm:$0xff]   ;;  %s4743_s27 = sld [smem:[#allocation6_spill]]  ;;  %s4744_s28 = sld [smem:[#allocation8_spill]]  ;;  %vm300_vm2 = vcmask 130048  }
  0x1e   :  { %s4745_s29 = sld [smem:[#allocation12_spill]]  ;;  %s4746_s30 = sld [smem:[#allocation7_spill]]  ;;  %vm420_vm3 = vcmask 523264   ;;  %v3691_v51 = vld [vmem:[%s4711_s12 + $0x20] sm:$0xff]   ;;  %v3692_v52 = vld [vmem:[%s4711_s12 + $0x28] sm:$0xff]   ;;  %v3693_v53 = vld [vmem:[%s4711_s12 + $0x30] sm:$0xff]  }
  0x1f   :  { %3410 = vmatpush3.bf16.msra.mxu0 %v3670_v5  ;;  %s4747_s10 = sld [smem:[#allocation15_spill]]  ;;  %s4748_s2 = sld [smem:[#allocation14_spill]]  ;;  %v2988_v0 = vld [vmem:[%s4710_s11] ss:$0 sm:$0xff]  ;;  %vm1818_vm4 = vcmask 1043456   ;;  %vm1801_vm5 = vcmask 64512  }
  0x20   :  { %3415 = vmatprep.subr.bf16.mxu0 %v3851_v1  ;;  %s4749_s4 = sld [smem:[#allocation9_spill]]  ;;  %s3855_s0 = smov [#allocation2]  }
  0x23   :  { %v3671_v6 = vld [vmem:[%s4743_s27] sm:$0xff]  }
  0x24   :  { %3412 = vmatmul.mubr.msk.bf16.vlgmr.msra.gmra.mrb[4].mxu0 %vm121_vm1, %v3671_v6  ;;  %v4026_v7 = vld [vmem:[%s4744_s28] sm:$0xff]  }
  0x25   :  { %3417 = vmatprep.mubr.msk.bf16.mxu0 %vm3852_vm0, %v3851_v1  ;;  %616 = vxpose.xlu0.c.b16.start.end [1/1] (short) (narrow) %v4026_v7, 16  ;;  %v2959_v8 = vld [vmem:[%s4745_s29] ss:$0 sm:$0xff]  ;;  %v3676_v21 = vld [vmem:[%s4747_s10 + $0x28] sm:$0xff]   ;;  %v3678_v23 = vld [vmem:[%s4747_s10 + $0x30] sm:$0xff]   ;;  %s3854_s29 = smov 64  }
  0x26   :  { %v4037_v18 = vld [vmem:[%s4746_s30] sm:$0xff]   ;;  %v3677_v22 = vld [vmem:[%s4747_s10 + $0x8] sm:$0xff]   ;;  %v3679_v24 = vld [vmem:[%s4747_s10 + $0x10] sm:$0xff]  }
  0x27   :  { %v3674_v19 = vld [vmem:[%s4747_s10 + $0x20] sm:$0xff]   ;;  %v3680_v35 = vld [vmem:[%s4747_s10 + $0x38] sm:$0xff]   ;;  %v3683_v48 = vld [vmem:[%s4747_s10 + $0x48] sm:$0xff]  }
  0x28   :  { %v3675_v20 = vld [vmem:[%s4747_s10] sm:$0xff]   ;;  %v3681_v36 = vld [vmem:[%s4747_s10 + $0x18] sm:$0xff]   ;;  %v3684_v49 = vld [vmem:[%s4747_s10 + $0x50] sm:$0xff]  }
  0x29   :  { %v2964_v25 = vld [vmem:[%s4748_s2] ss:$0 sm:$0xff]  ;;  %v3685_v50 = vld [vmem:[%s4747_s10 + $0x58] sm:$0xff]  }
  0x2a   :  { %v3682_v43 = vld [vmem:[%s4747_s10 + $0x40] sm:$0xff]  }
  0xed   :  { %v159_v9 = vpop.f32.mrb[0].mxu0 }
  0xee   :  { %v160_v10 = vadd.f32 %v2959_v8, %v159_v9  ;;  %v3405_v11 = vpop.f32.mrb[1].mxu0 }
  0xef   :  { %v162_v12 = vpop.f32.mrb[2].mxu0 }
  0xf0   :  { %v163_v13 = vadd.f32 %v2959_v8, %v162_v12  ;;  %v3406_v14 = vpop.f32.mrb[3].mxu0  ;;  %v166_v15 = vmax.f32 %v160_v10, 0.0 }
  0xf1   :  { %v4129_v14 = vpop.trf.xlu0 }
  0xf2   :  { %v167_v16 = vmax.f32 %v163_v13, 0.0 }
  0xf4   :  { %v4032_v17 = vpack.c.bf16 %v167_v16, %v166_v15  ;;  %v4141_v15 = vld [vmem:[%s4749_s4] sm:$0xff]   ;;  %s4750_s4 = sld [smem:[#allocation10_spill]] }
  0xf5   :  { %v3687_v16 = vld [vmem:[%s4711_s12] sm:$0xff]  }
  0xf6   :  { %3416 = vmatpush3.bf16.msra.mxu0 %v4032_v17  ;;  %3422 = vmatpush3.bf16.msra.mxu1 %v4032_v17 }
  0xf7   :  { %3427 = vmatprep.subr.bf16.mxu0 %v3851_v1  ;;  %3439 = vmatprep.subr.bf16.mxu1 %v3851_v1  ;;  %v235_v26 = vpop.f32.mrb[4].mxu0 }
  0xf8   :  { %v236_v27 = vadd.f32 %v2964_v25, %v235_v26  ;;  %v3413_v28 = vpop.f32.mrb[5].mxu0  ;;  %v3695_v26 = vld [vmem:[%s4711_s12 + $0x40] sm:$0xff]  }
  0xf9   :  { %3418 = vmatmul.mubr.msk.bf16.vlgmr.msra.gmra.mrb[8].mxu0 %vm300_vm2, %v4037_v18  ;;  %3424 = vmatmul.mubr.msk.bf16.vlgmr.msra.gmra.mrb[0].mxu1 %vm300_vm2, %v4026_v7  ;;  %v238_v29 = vpop.f32.mrb[6].mxu0 }
  0xfa   :  { %3428 = vmatpush3.bf16.msra.mxu0 %v3674_v19  ;;  %3440 = vmatpush3.bf16.msra.mxu1 %v3675_v20  ;;  %v242_v30 = vmax.f32 %v236_v27, 0.0  ;;  %v239_v31 = vadd.f32 %v2964_v25, %v238_v29  ;;  %v3414_v32 = vpop.f32.mrb[7].mxu0  ;;  %v3688_v19 = vld [vmem:[%s4711_s12 + $0x8] sm:$0xff]   ;;  %v3689_v20 = vld [vmem:[%s4711_s12 + $0x10] sm:$0xff]  }
  0xfb   :  { %3429 = vmatprep.subr.bf16.mxu0 %v3851_v1  ;;  %3441 = vmatprep.subr.bf16.mxu1 %v3851_v1 }
  0xfc   :  { %3435 = vmatprep.mubr.msk.bf16.mxu0 %vm3852_vm0, %v3851_v1  ;;  %3447 = vmatprep.mubr.msk.bf16.mxu1 %vm3852_vm0, %v3851_v1  ;;  %v243_v33 = vmax.f32 %v239_v31, 0.0  ;;  %v3697_v31 = vld [vmem:[%s4711_s12 + $0x50] sm:$0xff]  }
  0xfe   :  { %3430 = vmatpush3.bf16.msra.mxu0 %v3676_v21  ;;  %3442 = vmatpush3.bf16.msra.mxu1 %v3677_v22  ;;  %v533_v34 = vpack.c.bf16 %v243_v33, %v242_v30  ;;  %v3690_v21 = vld [vmem:[%s4711_s12 + $0x18] sm:$0xff]  }
  0xff   :  { %3431 = vmatprep.subr.bf16.mxu0 %v3851_v1  ;;  %3443 = vmatprep.subr.bf16.mxu1 %v3851_v1  ;;  %v3694_v22 = vld [vmem:[%s4711_s12 + $0x38] sm:$0xff]  }
 0x102   :  { %3432 = vmatpush3.bf16.msra.mxu0 %v3678_v23  ;;  %3444 = vmatpush3.bf16.msra.mxu1 %v3679_v24 }
 0x103   :  { %3433 = vmatprep.subr.bf16.mxu0 %v3851_v1  ;;  %3445 = vmatprep.subr.bf16.mxu1 %v3851_v1 }
 0x106   :  { %3434 = vmatpush3.bf16.msra.mxu0 %v3680_v35  ;;  %3446 = vmatpush3.bf16.msra.mxu1 %v3681_v36  ;;  %v3698_v35 = vld [vmem:[%s4711_s12 + $0x58] sm:$0xff]  }
 0x107   :  { %3451 = vmatprep.subr.bf16.mxu0 %v3851_v1  ;;  %3463 = vmatprep.subr.bf16.mxu1 %v3851_v1 }
 0x1cc   :  { %v338_v37 = vpop.f32.mrb[8].mxu0  ;;  %v387_v38 = vpop.f32.mrb[0].mxu1 }
 0x1cd   :  { %v3419_v39 = vpop.f32.mrb[9].mxu0  ;;  %v3425_v40 = vpop.f32.mrb[1].mxu1 }
 0x1ce   :  { %v341_v41 = vpop.f32.mrb[10].mxu0  ;;  %v390_v42 = vpop.f32.mrb[2].mxu1  ;;  %v3701_v40 = vld [vmem:[%s4747_s10 + $0x80] sm:$0xff]  }
 0x1cf   :  { %v394_v44 = vpack.c.bf16 %v341_v41, %v338_v37  ;;  %v395_v45 = vpack.c.bf16 %v390_v42, %v387_v38  ;;  %v3426_v46 = vpop.f32.mrb[3].mxu1  ;;  %v3420_v47 = vpop.f32.mrb[11].mxu0 }
 0x1d0   :  { %v3007_v47 = vld [vmem:[%s4712_s13] ss:$0 sm:$0xff] }
 0x1d1   :  { %3436 = vmatmul.mubr.msk.bf16.vlgmr.msra.gmra.mrb[12].mxu0 %vm420_vm3, %v395_v45  ;;  %3448 = vmatmul.mubr.msk.bf16.vlgmr.msra.gmra.mrb[4].mxu1 %vm420_vm3, %v394_v44 }
 0x1d2   :  { %3452 = vmatpush3.bf16.msra.mxu0 %v3682_v43  ;;  %3459 = vmatprep.mubr.msk.bf16.mxu0 %vm3852_vm0, %v3851_v1 }
 0x1d3   :  { %3453 = vmatprep.subr.bf16.mxu0 %v3851_v1  ;;  %3465 = vmatprep.mubr.msk.bf16.mxu1 %vm3852_vm0, %v3851_v1 }
 0x1d6   :  { %3454 = vmatpush3.bf16.msra.mxu0 %v3683_v48 }
 0x1d7   :  { %3455 = vmatprep.subr.bf16.mxu0 %v3851_v1 }
 0x1da   :  { %3456 = vmatpush3.bf16.msra.mxu0 %v3684_v49 }
 0x1db   :  { %3457 = vmatprep.subr.bf16.mxu0 %v3851_v1 }
 0x1de   :  { %3458 = vmatpush3.bf16.msra.mxu0 %v3685_v50 }
 0x1df   :  { %3475 = vmatprep.subr.bf16.mxu0 %v3851_v1 }
 0x1e1   :  { %3460 = vmatmul.mubr.msk.bf16.vlgmr.msra.gmra.mrb[16].mxu0 %vm420_vm3, %v533_v34 }
 0x1e2   :  { %3483 = vmatprep.mubr.msk.bf16.mxu0 %vm3852_vm0, %v3851_v1  ;;  %3476 = vmatpush3.bf16.msra.mxu0 %v3691_v51 }
 0x1e3   :  { %3477 = vmatprep.subr.bf16.mxu0 %v3851_v1 }
 0x1e6   :  { %3478 = vmatpush3.bf16.msra.mxu0 %v3692_v52 }
 0x1e7   :  { %3479 = vmatprep.subr.bf16.mxu0 %v3851_v1 }
 0x1ea   :  { %3480 = vmatpush3.bf16.msra.mxu0 %v3693_v53 }
 0x1eb   :  { %3481 = vmatprep.subr.bf16.mxu0 %v3851_v1 }
 0x1ee   :  { %3482 = vmatpush3.bf16.msra.mxu0 %v3694_v22  ;;  %v3716_v22 = vld [vmem:[%s4711_s12 + $0x88] sm:$0xff]  }
 0x1ef   :  { %3499 = vmatprep.subr.bf16.mxu0 %v3851_v1 }
 0x2a4   :  { %v458_v54 = vpop.f32.mrb[12].mxu0  ;;  %v526_v55 = vpop.f32.mrb[4].mxu1 }
 0x2a5   :  { %v527_v56 = vadd.f32 %v526_v55, %v458_v54  ;;  %v3437_v57 = vpop.f32.mrb[13].mxu0  ;;  %v3449_v58 = vpop.f32.mrb[5].mxu1 }
 0x2a6   :  { %v461_v59 = vpop.f32.mrb[14].mxu0  ;;  %v529_v60 = vpop.f32.mrb[6].mxu1 }
 0x2a7   :  { %v530_v61 = vadd.f32 %v529_v60, %v461_v59  ;;  %v3438_v62 = vpop.f32.mrb[15].mxu0  ;;  %v3450_v63 = vpop.f32.mrb[7].mxu1  ;;  %v3699_v59 = vld [vmem:[%s4747_s10 + $0x60] sm:$0xff]   ;;  %v3700_v60 = vld [vmem:[%s4747_s10 + $0x68] sm:$0xff]  }
 0x2a8   :  { %v3705_v62 = vld [vmem:[%s4747_s10 + $0x90] sm:$0xff]   ;;  %v3706_v63 = vld [vmem:[%s4747_s10 + $0x98] sm:$0xff]  }
 0x2b4   :  { %v595_v2 = vpop.f32.mrb[16].mxu0 }
 0x2b5   :  { %v602_v3 = vadd.f32 %v595_v2, %v527_v56  ;;  %v3461_v4 = vpop.f32.mrb[17].mxu0 }
 0x2b6   :  { %v598_v5 = vpop.f32.mrb[18].mxu0 }
 0x2b7   :  { %v610_v6 = vadd.f32 %v2988_v0, %v602_v3  ;;  %v603_v8 = vadd.f32 %v598_v5, %v530_v61  ;;  %v3462_v9 = vpop.f32.mrb[19].mxu0  ;;  %v3704_v61 = vld [vmem:[%s4747_s10 + $0x78] sm:$0xff]  }
 0x2b9   :  { %v611_v10 = vadd.f32 %v2988_v0, %v603_v8  ;;  %v612_v11 = vmax.f32 %v610_v6, 0.0 }
 0x2bb   :  { %v613_v12 = vmax.f32 %v611_v10, 0.0  ;;  %v3707_v10 = vld [vmem:[%s4747_s10 + $0xa0] sm:$0xff]  }
 0x2bd   :  { %v4126_v13 = vpack.c.bf16 %v613_v12, %v612_v11 }
 0x2bf   :  { %3464 = vmatpush3.bf16.msra.mxu1 %v4126_v13 }
 0x2c0   :  { %3469 = vmatprep.subr.bf16.mxu1 %v3851_v1 }
 0x2c2   :  { %3466 = vmatmul.mubr.msk.bf16.vlgmr.msra.gmra.mrb[8].mxu1 %vm300_vm2, %v4129_v14 }
 0x2c3   :  { %3470 = vmatpush3.bf16.msra.mxu1 %v4032_v17  ;;  %3471 = vmatprep.mubr.msk.bf16.mxu1 %vm3852_vm0, %v3851_v1 }
 0x2c4   :  { %3487 = vmatprep.subr.bf16.mxu1 %v3851_v1 }
 0x2ca   :  { %3472 = vmatmul.mubr.msk.bf16.vlgmr.msra.gmra.mrb[12].mxu1 %vm300_vm2, %v4141_v15 }
 0x2cb   :  { %3488 = vmatpush3.bf16.msra.mxu1 %v3687_v16  ;;  %3495 = vmatprep.mubr.msk.bf16.mxu1 %vm3852_vm0, %v3851_v1  ;;  %v3708_v16 = vld [vmem:[%s4747_s10 + $0xa8] sm:$0xff]  }
 0x2cc   :  { %3489 = vmatprep.subr.bf16.mxu1 %v3851_v1 }
 0x2cf   :  { %3490 = vmatpush3.bf16.msra.mxu1 %v3688_v19  ;;  %v3709_v19 = vld [vmem:[%s4747_s10 + $0xb0] sm:$0xff]  }
 0x2d0   :  { %3491 = vmatprep.subr.bf16.mxu1 %v3851_v1 }
 0x2d3   :  { %3492 = vmatpush3.bf16.msra.mxu1 %v3689_v20  ;;  %v3710_v20 = vld [vmem:[%s4747_s10 + $0xb8] sm:$0xff]  }
 0x2d4   :  { %3493 = vmatprep.subr.bf16.mxu1 %v3851_v1 }
 0x2d7   :  { %3494 = vmatpush3.bf16.msra.mxu1 %v3690_v21  ;;  %v3715_v21 = vld [vmem:[%s4711_s12 + $0x80] sm:$0xff]  }
 0x2d8   :  { %3511 = vmatprep.subr.bf16.mxu1 %v3851_v1 }
 0x2da   :  { %3496 = vmatmul.mubr.msk.bf16.vlgmr.msra.gmra.mrb[16].mxu1 %vm420_vm3, %v4032_v17  ;;  %v3696_v17 = vld [vmem:[%s4711_s12 + $0x48] sm:$0xff]  }
 0x2db   :  { %3513 = vmatprep.mubr.msk.bf16.mxu1 %vm3852_vm0, %v3851_v1 }
 0x395   :  { %v669_v23 = vpop.f32.mrb[8].mxu1 }
 0x396   :  { %v3467_v24 = vpop.f32.mrb[9].mxu1 }
 0x397   :  { %v672_v25 = vpop.f32.mrb[10].mxu1 }
 0x398   :  { %v725_v27 = vpack.c.bf16 %v672_v25, %v669_v23  ;;  %v3468_v28 = vpop.f32.mrb[11].mxu1  ;;  %v3717_v23 = vld [vmem:[%s4711_s12 + $0x90] sm:$0xff]  }
 0x39a   :  { %3484 = vmatmul.mubr.msk.bf16.vlgmr.msra.gmra.mrb[20].mxu0 %vm420_vm3, %v725_v27 }
 0x39b   :  { %3500 = vmatpush3.bf16.msra.mxu0 %v3695_v26  ;;  %3507 = vmatprep.mubr.msk.bf16.mxu0 %vm3852_vm0, %v3851_v1 }
 0x39c   :  { %3501 = vmatprep.subr.bf16.mxu0 %v3851_v1 }
 0x39d   :  { %v718_v29 = vpop.f32.mrb[12].mxu1 }
 0x39e   :  { %v3473_v30 = vpop.f32.mrb[13].mxu1 }
 0x39f   :  { %3502 = vmatpush3.bf16.msra.mxu0 %v3696_v17  ;;  %v721_v32 = vpop.f32.mrb[14].mxu1 }
 0x3a0   :  { %3503 = vmatprep.subr.bf16.mxu0 %v3851_v1  ;;  %v862_v33 = vpack.c.bf16 %v721_v32, %v718_v29  ;;  %v3474_v34 = vpop.f32.mrb[15].mxu1  ;;  %v3075_v32 = vld [vmem:[%s4710_s11 + $0x1] ss:$0 sm:$0xff] }
 0x3a3   :  { %3504 = vmatpush3.bf16.msra.mxu0 %v3697_v31 }
 0x3a4   :  { %3505 = vmatprep.subr.bf16.mxu0 %v3851_v1 }
 0x3a7   :  { %3506 = vmatpush3.bf16.msra.mxu0 %v3698_v35 }
 0x3a8   :  { %3523 = vmatprep.subr.bf16.mxu0 %v3851_v1 }
 0x3aa   :  { %3508 = vmatmul.mubr.msk.bf16.vlgmr.msra.gmra.mrb[24].mxu0 %vm420_vm3, %v862_v33 }
 0x3ab   :  { %3531 = vmatprep.mubr.msk.bf16.mxu0 %vm3852_vm0, %v3851_v1  ;;  %3524 = vmatpush3.bf16.msra.mxu0 %v3701_v40 }
 0x3ac   :  { %3525 = vmatprep.subr.bf16.mxu0 %v3851_v1 }
 0x3ad   :  { %v855_v36 = vpop.f32.mrb[16].mxu1 }
 0x3ae   :  { %v3497_v37 = vpop.f32.mrb[17].mxu1 }
 0x3af   :  { %v858_v38 = vpop.f32.mrb[18].mxu1 }
 0x3b0   :  { %v3498_v39 = vpop.f32.mrb[19].mxu1 }
 0x46d   :  { %v787_v41 = vpop.f32.mrb[20].mxu0 }
 0x46e   :  { %v856_v42 = vadd.f32 %v855_v36, %v787_v41  ;;  %v3485_v43 = vpop.f32.mrb[21].mxu0 }
 0x46f   :  { %v790_v44 = vpop.f32.mrb[22].mxu0 }
 0x470   :  { %v859_v45 = vadd.f32 %v858_v38, %v790_v44  ;;  %v3486_v46 = vpop.f32.mrb[23].mxu0  ;;  %v3711_v44 = vld [vmem:[%s4711_s12 + $0x60] sm:$0xff]  }
 0x471   :  { %v3718_v46 = vld [vmem:[%s4711_s12 + $0x98] sm:$0xff]  }
 0x47d   :  { %v924_v48 = vpop.f32.mrb[24].mxu0 }
 0x47e   :  { %v931_v49 = vadd.f32 %v924_v48, %v856_v42  ;;  %v3509_v50 = vpop.f32.mrb[25].mxu0 }
 0x47f   :  { %v927_v51 = vpop.f32.mrb[26].mxu0  ;;  %v3719_v50 = vld [vmem:[%s4711_s12 + $0xa0] sm:$0xff]  }
 0x480   :  { %v939_v52 = vadd.f32 %v3007_v47, %v931_v49  ;;  %v932_v53 = vadd.f32 %v927_v51, %v859_v45  ;;  %v3510_v54 = vpop.f32.mrb[27].mxu0  ;;  %v3712_v45 = vld [vmem:[%s4711_s12 + $0x68] sm:$0xff]  }
 0x482   :  { %v940_v55 = vadd.f32 %v3007_v47, %v932_v53  ;;  %v941_v56 = vmax.f32 %v939_v52, 0.0  ;;  %v3720_v53 = vld [vmem:[%s4711_s12 + $0xa8] sm:$0xff]  }
 0x484   :  { %v942_v57 = vmax.f32 %v940_v55, 0.0 }
 0x486   :  { %v4200_v58 = vpack.c.bf16 %v942_v57, %v941_v56  ;;  %v3721_v56 = vld [vmem:[%s4711_s12 + $0xb0] sm:$0xff]  }
 0x488   :  { %3512 = vmatpush3.bf16.msra.mxu1 %v4200_v58 }
 0x489   :  { %3517 = vmatprep.subr.bf16.mxu1 %v3851_v1 }
 0x48b   :  { %3514 = vmatmul.mubr.msk.bf16.vlgmr.msra.gmra.mrb[20].mxu1 %vm300_vm2, %v4037_v18  ;;  %v3702_v18 = vld [vmem:[%s4747_s10 + $0x70] sm:$0xff]  }
 0x48c   :  { %3518 = vmatpush3.bf16.msra.mxu1 %v4200_v58  ;;  %3519 = vmatprep.mubr.msk.bf16.mxu1 %vm3852_vm0, %v3851_v1 }
 0x48d   :  { %3535 = vmatprep.subr.bf16.mxu1 %v3851_v1 }
 0x493   :  { %3520 = vmatmul.mubr.msk.bf16.vlgmr.msra.gmra.mrb[24].mxu1 %vm300_vm2, %v4026_v7  ;;  %v3703_v7 = vld [vmem:[%s4747_s10 + $0x88] sm:$0xff]  }
 0x494   :  { %3536 = vmatpush3.bf16.msra.mxu1 %v3699_v59  ;;  %3543 = vmatprep.mubr.msk.bf16.mxu1 %vm3852_vm0, %v3851_v1 }
 0x495   :  { %3537 = vmatprep.subr.bf16.mxu1 %v3851_v1  ;;  %3526 = vmatpush3.bf16.msra.mxu0 %v3703_v7 }
 0x496   :  { %3527 = vmatprep.subr.bf16.mxu0 %v3851_v1 }
 0x498   :  { %3538 = vmatpush3.bf16.msra.mxu1 %v3700_v60  ;;  %v3722_v60 = vld [vmem:[%s4711_s12 + $0xb8] sm:$0xff]  }
 0x499   :  { %3539 = vmatprep.subr.bf16.mxu1 %v3851_v1  ;;  %3528 = vmatpush3.bf16.msra.mxu0 %v3705_v62 }
 0x49a   :  { %3529 = vmatprep.subr.bf16.mxu0 %v3851_v1 }
 0x49c   :  { %3540 = vmatpush3.bf16.msra.mxu1 %v3702_v18 }
 0x49d   :  { %3541 = vmatprep.subr.bf16.mxu1 %v3851_v1  ;;  %3530 = vmatpush3.bf16.msra.mxu0 %v3706_v63 }
 0x49e   :  { %3547 = vmatprep.subr.bf16.mxu0 %v3851_v1 }
 0x4a0   :  { %3542 = vmatpush3.bf16.msra.mxu1 %v3704_v61 }
 0x4a1   :  { %3559 = vmatprep.subr.bf16.mxu1 %v3851_v1 }
 0x55e   :  { %v1032_v0 = vpop.f32.mrb[20].mxu1 }
 0x55f   :  { %v3515_v2 = vpop.f32.mrb[21].mxu1 }
 0x560   :  { %v1035_v3 = vpop.f32.mrb[22].mxu1 }
 0x561   :  { %v1080_v4 = vpack.c.bf16 %v1035_v3, %v1032_v0  ;;  %v3516_v5 = vpop.f32.mrb[23].mxu1 }
 0x563   :  { %3544 = vmatmul.mubr.msk.bf16.vlgmr.msra.gmra.mrb[28].mxu1 %vm420_vm3, %v1080_v4 }
 0x564   :  { %3561 = vmatprep.mubr.msk.bf16.mxu1 %vm3852_vm0, %v3851_v1 }
 0x566   :  { %v1073_v6 = vpop.f32.mrb[24].mxu1 }
 0x567   :  { %v3521_v8 = vpop.f32.mrb[25].mxu1 }
 0x568   :  { %v1076_v9 = vpop.f32.mrb[26].mxu1 }
 0x569   :  { %v1081_v11 = vpack.c.bf16 %v1076_v9, %v1073_v6  ;;  %v3522_v12 = vpop.f32.mrb[27].mxu1  ;;  %v3093_v6 = vld [vmem:[%s4712_s13 + $0x1] ss:$0 sm:$0xff] }
 0x56b   :  { %3532 = vmatmul.mubr.msk.bf16.vlgmr.msra.gmra.mrb[28].mxu0 %vm420_vm3, %v1081_v11 }
 0x56c   :  { %3548 = vmatpush3.bf16.msra.mxu0 %v3707_v10  ;;  %3555 = vmatprep.mubr.msk.bf16.mxu0 %vm3852_vm0, %v3851_v1 }
 0x56d   :  { %3549 = vmatprep.subr.bf16.mxu0 %v3851_v1 }
 0x570   :  { %3550 = vmatpush3.bf16.msra.mxu0 %v3708_v16 }
 0x571   :  { %3551 = vmatprep.subr.bf16.mxu0 %v3851_v1 }
 0x574   :  { %3552 = vmatpush3.bf16.msra.mxu0 %v3709_v19 }
 0x575   :  { %3553 = vmatprep.subr.bf16.mxu0 %v3851_v1 }
 0x578   :  { %3554 = vmatpush3.bf16.msra.mxu0 %v3710_v20 }
 0x579   :  { %3571 = vmatprep.subr.bf16.mxu0 %v3851_v1 }
 0x57b   :  { %3556 = vmatmul.mubr.msk.bf16.vlgmr.msra.gmra.mrb[32].mxu0 %vm420_vm3, %v4126_v13 }
 0x57c   :  { %3579 = vmatprep.mubr.msk.bf16.mxu0 %vm3852_vm0, %v3851_v1  ;;  %3572 = vmatpush3.bf16.msra.mxu0 %v3715_v21 }
 0x57d   :  { %3573 = vmatprep.subr.bf16.mxu0 %v3851_v1 }
 0x580   :  { %3574 = vmatpush3.bf16.msra.mxu0 %v3716_v22 }
 0x581   :  { %3575 = vmatprep.subr.bf16.mxu0 %v3851_v1 }
 0x584   :  { %3576 = vmatpush3.bf16.msra.mxu0 %v3717_v23  ;;  %v1599_v23 = vld [vmem:[%s4750_s4] sm:$0xff] }
 0x585   :  { %3577 = vmatprep.subr.bf16.mxu0 %v3851_v1 }
 0x588   :  { %3578 = vmatpush3.bf16.msra.mxu0 %v3718_v46 }
 0x589   :  { %3595 = vmatprep.subr.bf16.mxu0 %v3851_v1 }
 0x636   :  { %v1211_v13 = vpop.f32.mrb[28].mxu1 }
 0x637   :  { %v3545_v24 = vpop.f32.mrb[29].mxu1 }
 0x638   :  { %v1214_v25 = vpop.f32.mrb[30].mxu1 }
 0x639   :  { %v3546_v26 = vpop.f32.mrb[31].mxu1 }
 0x63a   :  { %v3723_v26 = vld [vmem:[%s4713_s14] ss:$8 sps:$4 sm:$0xff]  }
 0x63e   :  { %v1143_v27 = vpop.f32.mrb[28].mxu0 }
 0x63f   :  { %v1212_v28 = vadd.f32 %v1211_v13, %v1143_v27  ;;  %v3533_v17 = vpop.f32.mrb[29].mxu0  ;;  %v3725_v13 = vld [vmem:[%s4713_s14 + $0x4] ss:$8 sps:$4 sm:$0xff]   ;;  %v3728_v27 = vld [vmem:[%s4713_s14 + $0x14] ss:$8 sps:$4 sm:$0xff]  }
 0x640   :  { %v1146_v29 = vpop.f32.mrb[30].mxu0  ;;  %v3731_v17 = vld [vmem:[%s4713_s14 + $0x24] ss:$8 sps:$4 sm:$0xff]  }
 0x641   :  { %v1215_v30 = vadd.f32 %v1214_v25, %v1146_v29  ;;  %v3534_v31 = vpop.f32.mrb[31].mxu0  ;;  %v1600_v25 = vpack.c.bf16 %v1599_v23, %v1599_v23  ;;  %v3729_v29 = vld [vmem:[%s4713_s14 + $0x20] ss:$8 sps:$4 sm:$0xff]  }
 0x642   :  { %v3732_v31 = vld [vmem:[%s4713_s14 + $0x30] ss:$8 sps:$4 sm:$0xff]  }
 0x64e   :  { %v1279_v33 = vpop.f32.mrb[32].mxu0 }
 0x64f   :  { %v1286_v34 = vadd.f32 %v1279_v33, %v1212_v28  ;;  %v3557_v35 = vpop.f32.mrb[33].mxu0  ;;  %v3726_v28 = vld [vmem:[%s4713_s14 + $0x10] ss:$8 sps:$4 sm:$0xff]  }
 0x650   :  { %v1282_v36 = vpop.f32.mrb[34].mxu0 }
 0x651   :  { %v1294_v37 = vadd.f32 %v3075_v32, %v1286_v34  ;;  %v1287_v38 = vadd.f32 %v1282_v36, %v1215_v30  ;;  %v3558_v39 = vpop.f32.mrb[35].mxu0  ;;  %v3734_v30 = vld [vmem:[%s4713_s14 + $0x34] ss:$8 sps:$4 sm:$0xff]  }
 0x653   :  { %v1295_v40 = vadd.f32 %v3075_v32, %v1287_v38  ;;  %v1296_v41 = vmax.f32 %v1294_v37, 0.0  ;;  %v3853_v32 = vmov 0   ;;  %v1656_v38 = vlaneseq }
 0x655   :  { %v1297_v42 = vmax.f32 %v1295_v40, 0.0  ;;  %v1657_v39 = vshrl.u32 %v1656_v38, 7  ;;  %v3750_v38 = vld [vmem:[%s4719_s20 + $0x34] ss:$8 sps:$4 sm:$0xff]  }
 0x657   :  { %v1298_v43 = vpack.c.bf16 %v1297_v42, %v1296_v41  ;;  %v4380_v40 = vsub.s32 0, %v1657_v39  ;;  %v1654_v41 = vld [vmem:[%s4714_s15] sm:$0x3] }
 0x659   :  { %3560 = vmatpush3.bf16.msra.mxu1 %v1298_v43  ;;  %v1659_v42 = vrot.slane %v1654_v41, %v4380_v40 }
 0x65a   :  { %3565 = vmatprep.subr.bf16.mxu1 %v3851_v1 }
 0x65c   :  { %3562 = vmatmul.mubr.msk.bf16.vlgmr.msra.gmra.mrb[32].mxu1 %vm300_vm2, %v4129_v14  ;;  %v3713_v14 = vld [vmem:[%s4711_s12 + $0x70] sm:$0xff]  }
 0x65d   :  { %3566 = vmatpush3.bf16.msra.mxu1 %v4200_v58  ;;  %3567 = vmatprep.mubr.msk.bf16.mxu1 %vm3852_vm0, %v3851_v1 }
 0x65e   :  { %3583 = vmatprep.subr.bf16.mxu1 %v3851_v1 }
 0x664   :  { %3568 = vmatmul.mubr.msk.bf16.vlgmr.msra.gmra.mrb[36].mxu1 %vm300_vm2, %v4141_v15  ;;  %v3714_v15 = vld [vmem:[%s4711_s12 + $0x78] sm:$0xff]  }
 0x665   :  { %3584 = vmatpush3.bf16.msra.mxu1 %v3711_v44  ;;  %3591 = vmatprep.mubr.msk.bf16.mxu1 %vm3852_vm0, %v3851_v1 }
 0x666   :  { %3585 = vmatprep.subr.bf16.mxu1 %v3851_v1 }
 0x669   :  { %3586 = vmatpush3.bf16.msra.mxu1 %v3712_v45 }
 0x66a   :  { %3587 = vmatprep.subr.bf16.mxu1 %v3851_v1 }
 0x66d   :  { %3588 = vmatpush3.bf16.msra.mxu1 %v3713_v14 }
 0x66e   :  { %3589 = vmatprep.subr.bf16.mxu1 %v3851_v1 }
 0x671   :  { %3590 = vmatpush3.bf16.msra.mxu1 %v3714_v15 }
 0x672   :  { %3607 = vmatprep.subr.bf16.mxu1 %v3851_v1 }
 0x674   :  { %3592 = vmatmul.mubr.msk.bf16.vlgmr.msra.gmra.mrb[40].mxu1 %vm420_vm3, %v4200_v58 }
 0x675   :  { %3609 = vmatprep.mubr.msk.bf16.mxu1 %vm3852_vm0, %v3851_v1 }
 0x72f   :  { %v1333_v47 = vpop.f32.mrb[32].mxu1 }
 0x730   :  { %v3563_v48 = vpop.f32.mrb[33].mxu1 }
 0x731   :  { %v1336_v49 = vpop.f32.mrb[34].mxu1 }
 0x732   :  { %v1381_v51 = vpack.c.bf16 %v1336_v49, %v1333_v47  ;;  %v3564_v52 = vpop.f32.mrb[35].mxu1  ;;  %v4387_v47 = vsub.s32 1, %v1657_v39  ;;  %v3751_v39 = vld [vmem:[%s4721_s22 + $0x40] sm:$0xff]  }
 0x734   :  { %3580 = vmatmul.mubr.msk.bf16.vlgmr.msra.gmra.mrb[36].mxu0 %vm420_vm3, %v1381_v51  ;;  %v1663_v48 = vrot.slane %v1654_v41, %v4387_v47  ;;  %v3752_v41 = vld [vmem:[%s4721_s22] sm:$0xff]  }
 0x735   :  { %3596 = vmatpush3.bf16.msra.mxu0 %v3719_v50  ;;  %3603 = vmatprep.mubr.msk.bf16.mxu0 %vm3852_vm0, %v3851_v1 }
 0x736   :  { %3597 = vmatprep.subr.bf16.mxu0 %v3851_v1 }
 0x737   :  { %v1374_v54 = vpop.f32.mrb[36].mxu1 }
 0x738   :  { %v3569_v55 = vpop.f32.mrb[37].mxu1 }
 0x739   :  { %3598 = vmatpush3.bf16.msra.mxu0 %v3720_v53  ;;  %v1377_v57 = vpop.f32.mrb[38].mxu1 }
 0x73a   :  { %3599 = vmatprep.subr.bf16.mxu0 %v3851_v1  ;;  %v1518_v58 = vpack.c.bf16 %v1377_v57, %v1374_v54  ;;  %v3570_v59 = vpop.f32.mrb[39].mxu1 }
 0x73d   :  { %3600 = vmatpush3.bf16.msra.mxu0 %v3721_v56 }
 0x73e   :  { %3601 = vmatprep.subr.bf16.mxu0 %v3851_v1 }
 0x741   :  { %3602 = vmatpush3.bf16.msra.mxu0 %v3722_v60 }
 0x742   :  { %3613 = vmatprep.subr.bf16.mxu0 %v3851_v1 }
 0x744   :  { %3604 = vmatmul.mubr.msk.bf16.vlgmr.msra.gmra.mrb[40].mxu0 %vm420_vm3, %v1518_v58 }
 0x745   :  { %3615 = vmatprep.mubr.msk.bf16.mxu0 %vm3852_vm0, %v3851_v1 }
 0x747   :  { %v1511_v18 = vpop.f32.mrb[40].mxu1 }
 0x748   :  { %v3593_v7 = vpop.f32.mrb[41].mxu1 }
 0x749   :  { %v1514_v61 = vpop.f32.mrb[42].mxu1 }
 0x74a   :  { %v3594_v62 = vpop.f32.mrb[43].mxu1 }
 0x807   :  { %v1443_v63 = vpop.f32.mrb[36].mxu0 }
 0x808   :  { %v1512_v0 = vadd.f32 %v1511_v18, %v1443_v63  ;;  %v3581_v2 = vpop.f32.mrb[37].mxu0  ;;  %v3735_v63 = vld [vmem:[%s4715_s16] sm:$0xff]  }
 0x809   :  { %v1446_v3 = vpop.f32.mrb[38].mxu0  ;;  %v3737_v2 = vld [vmem:[%s4715_s16 + $0x10] sm:$0xff]  }
 0x80a   :  { %v1515_v4 = vadd.f32 %v1514_v61, %v1446_v3  ;;  %v3582_v5 = vpop.f32.mrb[39].mxu0 }
 0x817   :  { %v1580_v8 = vpop.f32.mrb[40].mxu0 }
 0x818   :  { %v1587_v9 = vadd.f32 %v1580_v8, %v1512_v0  ;;  %v3605_v10 = vpop.f32.mrb[41].mxu0  ;;  %v3736_v0 = vld [vmem:[%s4715_s16 + $0x8] sm:$0xff]   ;;  %v3738_v8 = vld [vmem:[%s4715_s16 + $0x18] sm:$0xff]  }
 0x819   :  { %v1583_v11 = vpop.f32.mrb[42].mxu0 }
 0x81a   :  { %v1595_v12 = vadd.f32 %v3093_v6, %v1587_v9  ;;  %v1588_v16 = vadd.f32 %v1583_v11, %v1515_v4  ;;  %v3606_v19 = vpop.f32.mrb[43].mxu0 }
 0x81b   :  { %v3106_v19 = vld [vmem:[%s4716_s17] ss:$0 sm:$0xff] }
 0x81c   :  { %v1596_v20 = vadd.f32 %v3093_v6, %v1588_v16  ;;  %v1597_v21 = vmax.f32 %v1595_v12, 0.0 }
 0x81e   :  { %v1598_v22 = vmax.f32 %v1596_v20, 0.0 }
 0x820   :  { %v1601_v24 = vpack.c.bf16 %v1598_v22, %v1597_v21 }
 0x822   :  { %3608 = vmatpush3.bf16.msra.mxu1 %v1601_v24 }
 0x823   :  { %1709 = vmatprep.subr.bf16.mxu1 %v3725_v13 }
 0x825   :  { %3610 = vmatmul.mubr.msk.bf16.vlgmr.msra.gmra.mrb[44].mxu1 %vm300_vm2, %v1600_v25 }
 0x826   :  { %1710 = vmatpush1.bf16.msra.mxu1 %v3723_v26  ;;  %1741 = vmatprep.mubr.bf16.mxu1 %v3853_v32 }
 0x827   :  { %1711 = vmatprep.subr.bf16.mxu1 %v3728_v27 }
 0x82a   :  { %1712 = vmatpush1.bf16.msra.mxu1 %v3726_v28 }
 0x82b   :  { %1713 = vmatprep.subr.bf16.mxu1 %v3731_v17 }
 0x82e   :  { %1714 = vmatpush1.bf16.msra.mxu1 %v3729_v29 }
 0x82f   :  { %1715 = vmatprep.subr.bf16.mxu1 %v3734_v30  ;;  %v3741_v30 = vld [vmem:[%s4719_s20 + $0x4] ss:$8 sps:$4 sm:$0xff]  }
 0x832   :  { %1716 = vmatpush1.bf16.msra.mxu1 %v3732_v31  ;;  %v3739_v31 = vld [vmem:[%s4719_s20] ss:$8 sps:$4 sm:$0xff]  }
 0x833   :  { %3625 = vmatprep.subr.bf16.mxu1 %v3851_v1 }
 0x8f8   :  { %v4373_v33 = vpop.f32.mrb[44].mxu1 }
 0x8f9   :  { %v1653_v34 = vpack.c.bf16 %v4373_v33, %v4373_v33  ;;  %v3611_v35 = vpop.f32.mrb[45].mxu1 }
 0x8fa   :  { %v1642_v36 = vpop.f32.mrb[46].mxu1  ;;  %v3747_v35 = vld [vmem:[%s4719_s20 + $0x24] ss:$8 sps:$4 sm:$0xff]  }
 0x8fb   :  { %3103 = vmatmul.mubr.msk.bf16.vlgmr.msra.gmra.mrb[48].mxu1 %vm420_vm3, %v1653_v34  ;;  %v3612_v37 = vpop.f32.mrb[47].mxu1  ;;  %v3742_v34 = vld [vmem:[%s4719_s20 + $0x10] ss:$8 sps:$4 sm:$0xff]   ;;  %v3745_v36 = vld [vmem:[%s4719_s20 + $0x20] ss:$8 sps:$4 sm:$0xff]  }
 0x8fc   :  { %3633 = vmatprep.mubr.msk.bf16.mxu1 %vm3852_vm0, %v3851_v1  ;;  %3626 = vmatpush3.bf16.msra.mxu1 %v3735_v63  ;;  %v3748_v37 = vld [vmem:[%s4719_s20 + $0x30] ss:$8 sps:$4 sm:$0xff]   ;;  %v1985_v63 = vld [vmem:[%s4720_s21] sm:$0x3] }
 0x8fd   :  { %3627 = vmatprep.subr.bf16.mxu1 %v3851_v1 }
 0x900   :  { %3628 = vmatpush3.bf16.msra.mxu1 %v3736_v0  ;;  %v1990_v0 = vrot.slane %v1985_v63, %v4380_v40 }
 0x901   :  { %3629 = vmatprep.subr.bf16.mxu1 %v3851_v1 }
 0x904   :  { %3630 = vmatpush3.bf16.msra.mxu1 %v3737_v2  ;;  %v1994_v2 = vrot.slane %v1985_v63, %v4387_v47 }
 0x905   :  { %3631 = vmatprep.subr.bf16.mxu1 %v3851_v1 }
 0x908   :  { %3632 = vmatpush3.bf16.msra.mxu1 %v3738_v8 }
 0x909   :  { %3346 = vmatprep.subr.bf16.mxu1 %v3751_v39  ;;  %v3778_v39 = vld [vmem:[%s4713_s14 + $0x74] ss:$8 sps:$4 sm:$0xff]  }
 0x9ce   :  { %v1743_v43 = vpop.f32.mrb[48].mxu1 }
 0x9cf   :  { %v1744_v44 = vadd.f32 %v1743_v43, %v1659_v42  ;;  %v1745_v45 = vpop.f32.mrb[49].mxu1  ;;  %v3753_v42 = vld [vmem:[%s4721_s22 + $0x48] sm:$0xff]  }
 0x9d0   :  { %v1747_v14 = vpop.f32.mrb[50].mxu1  ;;  %v1746_v50 = vadd.f32 %v1745_v45, %v1663_v48  ;;  %v3754_v43 = vld [vmem:[%s4721_s22 + $0x8] sm:$0xff]   ;;  %v3756_v45 = vld [vmem:[%s4721_s22 + $0x10] sm:$0xff]   ;;  %v3760_v48 = vld [vmem:[%s4721_s22 + $0x20] sm:$0xff]  }
 0x9d1   :  { %v1750_v15 = vpack.c.bf16 %v1744_v44, %v1744_v44  ;;  %v1748_v46 = vpop.f32.mrb[51].mxu1  ;;  %v3755_v44 = vld [vmem:[%s4721_s22 + $0x50] sm:$0xff]   ;;  %v3757_v14 = vld [vmem:[%s4721_s22 + $0x58] sm:$0xff]  }
 0x9d2   :  { %v1814_v52 = vpack.c.bf16 %v1746_v50, %v1746_v50  ;;  %v3759_v46 = vld [vmem:[%s4721_s22 + $0x60] sm:$0xff]   ;;  %v3762_v50 = vld [vmem:[%s4721_s22 + $0x28] sm:$0xff]  }
 0x9d3   :  { %1752 = vrot.lane.b32.xlu0 %v1750_v15, %s3854_s29 }
 0x9d4   :  { %v1820_v53 = vsel %vm1818_vm4, %v1814_v52, 0 }
 0xa45   :  { %v1753_v49 = vpop.permute.xlu0 %1752 }
 0xa46   :  { %v1758_v51 = vsel %vm420_vm3, %v1753_v49, 0  ;;  %v3761_v49 = vld [vmem:[%s4721_s22 + $0x68] sm:$0xff]  }
 0xa47   :  { %3614 = vmatpush3.bf16.xpose.msra.mxu0 %v1758_v51 }
 0xa48   :  { %3619 = vmatprep.subr.bf16.mxu0 %v3851_v1 }
 0xa4e   :  { %3616 = vmatmul.mubr.msk.bf16.vlgmr.msra.gmra.mrb[44].mxu0 %vm420_vm3, %v1750_v15  ;;  %v3758_v15 = vld [vmem:[%s4721_s22 + $0x18] sm:$0xff]  }
 0xa4f   :  { %3620 = vmatpush3.bf16.msra.mxu0 %v1820_v53  ;;  %3621 = vmatprep.mubr.msk.bf16.mxu0 %vm3852_vm0, %v3851_v1 }
 0xa50   :  { %2040 = vmatprep.subr.bf16.mxu0 %v3741_v30 }
 0xb21   :  { %v1794_v54 = vpop.f32.mrb[44].mxu0 }
 0xb22   :  { %v1800_v55 = vmul.f32 0.125, %v1794_v54  ;;  %v3617_v56 = vpop.f32.mrb[45].mxu0 }
 0xb23   :  { %v1797_v57 = vpop.f32.mrb[46].mxu0 }
 0xb24   :  { %v3618_v58 = vpop.f32.mrb[47].mxu0  ;;  %v1802_v59 = vsel %vm1801_vm5, %v1800_v55, -inf  ;;  %v3113_v57 = vld [vmem:[%s4718_s19] ss:$0 sm:$0xff] }
 0xb25   :  { %1803 = vmax.xlane.f32.xlu1 %v1802_v59 }
 0xbb2   :  { %v1804_v60 = vpop.xlane.xlu1 %1803 }
 0xbb3   :  { %v1805_v18 = vsub.f32 %v1800_v55, %v1804_v60  ;;  %v3112_v55 = vld [vmem:[%s4717_s18] ss:$0 sm:$0xff] }
 0xbb5   :  { %v1806_v7 = vmul.f32 1.442695, %v1805_v18  ;;  %v3763_v18 = vld [vmem:[%s4721_s22 + $0x70] sm:$0xff]  }
 0xbb7   :  { %3811 = vpow2.f32 %v1806_v7  ;;  %v3764_v7 = vld [vmem:[%s4721_s22 + $0x30] sm:$0xff]  }
 0xbc1   :  { %v3812_v61 = vpop.eup %3811 }
 0xbc2   :  { %v1808_v62 = vsel %vm1801_vm5, %v3812_v61, 0.0 }
 0xbc3   :  { %1809 = vadd.xlane.f32.xlu1 %v1808_v62  ;;  %v3766_v62 = vld [vmem:[%s4721_s22 + $0x38] sm:$0xff]  }
 0xc50   :  { %v1810_v3 = vpop.xlane.xlu1 %1809 }
 0xc51   :  { %3813 = vrcp.f32 %v1810_v3 }
 0xc5b   :  { %v3814_v4 = vpop.eup %3813 }
 0xc5c   :  { %v1812_v5 = vmul.f32 %v3814_v4, %v3812_v61  ;;  %v3765_v61 = vld [vmem:[%s4721_s22 + $0x78] sm:$0xff]  }
 0xc5e   :  { %v1813_v6 = vpack.c.bf16 %v1812_v5, %v1812_v5 }
 0xc60   :  { %3622 = vmatmul.mubr.msk.bf16.vlgmr.msra.gmra.mrb[48].mxu0 %vm1801_vm5, %v1813_v6 }
 0xc61   :  { %2072 = vmatprep.mubr.bf16.mxu0 %v3853_v32  ;;  %2041 = vmatpush1.bf16.msra.mxu0 %v3739_v31  ;;  %v3769_v31 = vld [vmem:[%s4713_s14 + $0x44] ss:$8 sps:$4 sm:$0xff]  }
 0xd33   :  { %v1856_v9 = vpop.f32.mrb[48].mxu0 }
 0xd34   :  { %v1870_v10 = vpack.c.bf16 %v1856_v9, %v1856_v9  ;;  %v3623_v11 = vpop.f32.mrb[49].mxu0 }
 0xd35   :  { %v1859_v12 = vpop.f32.mrb[50].mxu0 }
 0xd36   :  { %v3624_v16 = vpop.f32.mrb[51].mxu0  ;;  %3634 = vmatmul.mubr.msk.bf16.vlgmr.msra.gmra.mrb[52].mxu1 %vm420_vm3, %v1870_v10 }
 0xd37   :  { %3347 = vmatpush3.bf16.msra.mxu1 %v3752_v41 }
 0xd38   :  { %3348 = vmatprep.subr.bf16.mxu1 %v3753_v42 }
 0xd3b   :  { %3349 = vmatpush3.bf16.msra.mxu1 %v3754_v43 }
 0xd3c   :  { %3350 = vmatprep.subr.bf16.mxu1 %v3755_v44 }
 0xd3f   :  { %3351 = vmatpush3.bf16.msra.mxu1 %v3756_v45  ;;  %v3140_v45 = vld [vmem:[%s4723_s24] ss:$0 sm:$0xff] }
 0xd40   :  { %3352 = vmatprep.subr.bf16.mxu1 %v3757_v14 }
 0xd43   :  { %3353 = vmatpush3.bf16.msra.mxu1 %v3758_v15  ;;  %v3141_v15 = vld [vmem:[%s4724_s25] ss:$0 sm:$0xff] }
 0xd44   :  { %3354 = vmatprep.subr.bf16.mxu1 %v3759_v46 }
 0xd47   :  { %3355 = vmatpush3.bf16.msra.mxu1 %v3760_v48 }
 0xd48   :  { %3356 = vmatprep.subr.bf16.mxu1 %v3761_v49 }
 0xd4b   :  { %3357 = vmatpush3.bf16.msra.mxu1 %v3762_v50  ;;  %v3150_v50 = vld [vmem:[%s4714_s15 + $0x2] sm:$0x3] }
 0xd4c   :  { %3358 = vmatprep.subr.bf16.mxu1 %v3763_v18 }
 0xd4f   :  { %3359 = vmatpush3.bf16.msra.mxu1 %v3764_v7 }
 0xd50   :  { %3360 = vmatprep.subr.bf16.mxu1 %v3765_v61 }
 0xd53   :  { %3361 = vmatpush3.bf16.msra.mxu1 %v3766_v62 }
 0xd54   :  { %3649 = vmatprep.subr.bf16.mxu1 %v3851_v1 }
 0xe09   :  { %v1939_v20 = vpop.f32.mrb[52].mxu1 }
 0xe0a   :  { %v1940_v21 = vadd.f32 %v3106_v19, %v1939_v20  ;;  %v3635_v22 = vpop.f32.mrb[53].mxu1  ;;  %v3123_v20 = vld [vmem:[%s4722_s23] ss:$0 sm:$0xff] }
 0xe0b   :  { %v1942_v23 = vpop.f32.mrb[54].mxu1 }
 0xe0c   :  { %v3636_v13 = vpop.f32.mrb[55].mxu1  ;;  %v1945_v24 = vadd.f32 %v1940_v21, %v4373_v33  ;;  %v3744_v33 = vld [vmem:[%s4719_s20 + $0x14] ss:$8 sps:$4 sm:$0xff]  }
 0xe0d   :  { %2042 = vmatprep.subr.bf16.mxu0 %v3744_v33  ;;  %v3767_v33 = vld [vmem:[%s4713_s14 + $0x40] ss:$8 sps:$4 sm:$0xff]  }
 0xe0e   :  { %v1948_v25 = vsel %vm420_vm3, %v1945_v24, 0.0  ;;  %2043 = vmatpush1.bf16.msra.mxu0 %v3742_v34  ;;  %v3772_v34 = vld [vmem:[%s4713_s14 + $0x54] ss:$8 sps:$4 sm:$0xff]  }
 0xe0f   :  { %1949 = vadd.xlane.f32.xlu1 %v1948_v25  ;;  %2044 = vmatprep.subr.bf16.mxu0 %v3747_v35  ;;  %v3770_v35 = vld [vmem:[%s4713_s14 + $0x50] ss:$8 sps:$4 sm:$0xff]  }
 0xe12   :  { %2045 = vmatpush1.bf16.msra.mxu0 %v3745_v36  ;;  %v3775_v36 = vld [vmem:[%s4713_s14 + $0x64] ss:$8 sps:$4 sm:$0xff]  }
 0xe13   :  { %2046 = vmatprep.subr.bf16.mxu0 %v3750_v38  ;;  %v3776_v38 = vld [vmem:[%s4713_s14 + $0x70] ss:$8 sps:$4 sm:$0xff]  }
 0xe16   :  { %2047 = vmatpush1.bf16.msra.mxu0 %v3748_v37  ;;  %v3773_v37 = vld [vmem:[%s4713_s14 + $0x60] ss:$8 sps:$4 sm:$0xff]   ;;  %s2951_s14 = sshll.u32 %s3855_s0, 4  ;;  %s2952_s14 = int_to_ptr.vmem [resolvable:$true] %s2951_s14 }
 0xe17   :  { %2356 = vmatprep.subr.bf16.mxu0 %v3769_v31  ;;  %s3827_s13 = scalar_lea.vmem %s2952_s14, 128  ;;  %p3832_p1 = scmp.lt.s32.totalorder %s2952_s14, %s2952_s14 }
 0xe18   :  { %p3828_p0 = scmp.ne.s32.totalorder %s2952_s14, %s3827_s13  ;;  %p3833_p2 = scmp.lt.s32.totalorder %s3827_s13, %s3827_s13 }
 0xe1a   :  { %p3834_p3 = por %p3833_p2, %p3832_p1 }
 0xe1c   :  { %p3835_p4 = pnand %p3834_p3, %p3828_p0 }
 0xe9c   :  { %v1950_v26 = vpop.xlane.xlu1 %1949 }
 0xe9d   :  { %v1952_v27 = vmul.f32 0.015625, %v1950_v26 }
 0xe9f   :  { %v1953_v28 = vsub.f32 %v1945_v24, %v1952_v27 }
 0xea1   :  { %v1954_v17 = vmul.f32 %v1953_v28, %v1953_v28 }
 0xea3   :  { %v1955_v29 = vsel %vm420_vm3, %v1954_v17, 0.0 }
 0xea4   :  { %1956 = vadd.xlane.f32.xlu1 %v1955_v29 }
 0xf31   :  { %v1957_v51 = vpop.xlane.xlu1 %1956 }
 0xf32   :  { %v1958_v52 = vmul.f32 0.015625, %v1957_v51  ;;  %v2306_v51 = vrot.slane %v3150_v50, %v4380_v40 }
 0xf34   :  { %v1959_v53 = vadd.f32 1e-05, %v1958_v52 }
 0xf36   :  { %3815 = vrsqrt.f32 %v1959_v53 }
 0xf40   :  { %v3816_v54 = vpop.eup %3815 }
 0xf41   :  { %v1961_v56 = vmul.f32 %v3816_v54, %v1953_v28 }
 0xf43   :  { %v1968_v58 = vmul.f32 %v3112_v55, %v1961_v56 }
 0xf45   :  { %v1975_v59 = vadd.f32 %v3113_v57, %v1968_v58  ;;  %v2310_v58 = vrot.slane %v3150_v50, %v4387_v47  ;;  %v3798_v50 = vld [vmem:[%s4721_s22 + $0x88] sm:$0xff]  }
 0xf47   :  { %v1984_v60 = vpack.c.bf16 %v1975_v59, %v1975_v59 }
 0xf49   :  { %3122 = vmatmul.mubr.msk.bf16.vlgmr.msra.gmra.mrb[52].mxu0 %vm420_vm3, %v1984_v60 }
 0xf4a   :  { %2388 = vmatprep.mubr.bf16.mxu0 %v3853_v32  ;;  %2357 = vmatpush1.bf16.msra.mxu0 %v3767_v33 }
 0xf4b   :  { %2358 = vmatprep.subr.bf16.mxu0 %v3772_v34 }
 0xf4e   :  { %2359 = vmatpush1.bf16.msra.mxu0 %v3770_v35 }
 0xf4f   :  { %2360 = vmatprep.subr.bf16.mxu0 %v3775_v36 }
 0xf52   :  { %2361 = vmatpush1.bf16.msra.mxu0 %v3773_v37 }
 0xf53   :  { %2362 = vmatprep.subr.bf16.mxu0 %v3778_v39  ;;  %v3785_v39 = vld [vmem:[%s4719_s20 + $0x44] ss:$8 sps:$4 sm:$0xff]  }
 0xf56   :  { %2363 = vmatpush1.bf16.msra.mxu0 %v3776_v38 }
 0xf57   :  { %3637 = vmatprep.subr.bf16.mxu0 %v3851_v1 }
0x101c   :  { %v2074_v3 = vpop.f32.mrb[52].mxu0 }
0x101d   :  { %v2075_v4 = vadd.f32 %v2074_v3, %v1990_v0  ;;  %v2076_v5 = vpop.f32.mrb[53].mxu0 }
0x101e   :  { %v2077_v6 = vadd.f32 %v2076_v5, %v1994_v2  ;;  %v2078_v8 = vpop.f32.mrb[54].mxu0 }
0x101f   :  { %v2081_v9 = vmax.f32 %v2075_v4, 0.0  ;;  %v2079_v10 = vpop.f32.mrb[55].mxu0 }
0x1020   :  { %v2082_v11 = vmax.f32 %v2077_v6, 0.0 }
0x1021   :  { %v2115_v16 = vpack.c.bf16 %v2081_v9, %v2081_v9 }
0x1022   :  { %v2116_v12 = vpack.c.bf16 %v2082_v11, %v2082_v11  ;;  %v3779_v11 = vld [vmem:[%s4715_s16 + $0x20] sm:$0xff]  }
0x1024   :  { %2252 = vmatprep.mubr.bf16.mxu1 %v2116_v12  ;;  %v3780_v12 = vld [vmem:[%s4715_s16 + $0x28] sm:$0xff]  }
0x1025   :  { %2253 = vmatmul.mubr.bf16.vlgmr.msra.gmra.mrb[56].mxu1 %v2115_v16  ;;  %v3781_v16 = vld [vmem:[%s4715_s16 + $0x30] sm:$0xff]  }
0x1026   :  { %3657 = vmatprep.mubr.msk.bf16.mxu1 %vm3852_vm0, %v3851_v1  ;;  %3650 = vmatpush3.bf16.msra.mxu1 %v3779_v11 }
0x1027   :  { %3651 = vmatprep.subr.bf16.mxu1 %v3851_v1 }
0x102a   :  { %3652 = vmatpush3.bf16.msra.mxu1 %v3780_v12 }
0x102b   :  { %3653 = vmatprep.subr.bf16.mxu1 %v3851_v1 }
0x102e   :  { %3654 = vmatpush3.bf16.msra.mxu1 %v3781_v16 }
0x102f   :  { %3655 = vmatprep.subr.bf16.mxu1 %v3851_v1 }
0x10f8   :  { %v3362_v19 = vpop.f32.mrb[56].mxu1 }
0x10f9   :  { %v3363_v21 = vpop.f32.mrb[57].mxu1 }
0x10fa   :  { %v3364_v22 = vadd.f32 %v3363_v21, %v3362_v19  ;;  %v3365_v23 = vpop.f32.mrb[58].mxu1 }
0x10fb   :  { %v3366_v13 = vpop.f32.mrb[59].mxu1  ;;  %v3782_v23 = vld [vmem:[%s4715_s16 + $0x38] sm:$0xff]  }
0x10fc   :  { %v2255_v24 = vadd.f32 %v3364_v22, %v3123_v20  ;;  %3656 = vmatpush3.bf16.msra.mxu1 %v3782_v23 }
0x10fe   :  { %v2260_v25 = vadd.f32 %v2255_v24, %v1975_v59 }
0x1100   :  { %v2263_v26 = vsel %vm420_vm3, %v2260_v25, 0.0 }
0x1101   :  { %2264 = vadd.xlane.f32.xlu0 %v2263_v26 }
0x118e   :  { %v2265_v27 = vpop.xlane.xlu0 %2264 }
0x118f   :  { %v2266_v28 = vmul.f32 0.015625, %v2265_v27 }
0x1191   :  { %v2267_v17 = vsub.f32 %v2260_v25, %v2266_v28 }
0x1193   :  { %v2268_v29 = vmul.f32 %v2267_v17, %v2267_v17 }
0x1195   :  { %v2269_v30 = vsel %vm420_vm3, %v2268_v29, 0.0 }
0x1196   :  { %2270 = vadd.xlane.f32.xlu1 %v2269_v30 }
0x1223   :  { %v2271_v41 = vpop.xlane.xlu1 %2270 }
0x1224   :  { %v2272_v42 = vmul.f32 0.015625, %v2271_v41  ;;  %v3783_v41 = vld [vmem:[%s4719_s20 + $0x40] ss:$8 sps:$4 sm:$0xff]  }
0x1226   :  { %v2273_v43 = vadd.f32 1e-05, %v2272_v42  ;;  %v3788_v42 = vld [vmem:[%s4719_s20 + $0x54] ss:$8 sps:$4 sm:$0xff]  }
0x1228   :  { %3817 = vrsqrt.f32 %v2273_v43  ;;  %v3786_v43 = vld [vmem:[%s4719_s20 + $0x50] ss:$8 sps:$4 sm:$0xff]  }
0x1232   :  { %v3818_v44 = vpop.eup %3817 }
0x1233   :  { %v2275_v14 = vmul.f32 %v3818_v44, %v2267_v17  ;;  %v3791_v44 = vld [vmem:[%s4719_s20 + $0x64] ss:$8 sps:$4 sm:$0xff]  }
0x1235   :  { %v2282_v46 = vmul.f32 %v3140_v45, %v2275_v14  ;;  %v3789_v45 = vld [vmem:[%s4719_s20 + $0x60] ss:$8 sps:$4 sm:$0xff]   ;;  %v3792_v14 = vld [vmem:[%s4719_s20 + $0x70] ss:$8 sps:$4 sm:$0xff]  }
0x1237   :  { %v4546_v48 = vadd.f32 %v3141_v15, %v2282_v46  ;;  %v3794_v15 = vld [vmem:[%s4719_s20 + $0x74] ss:$8 sps:$4 sm:$0xff]   ;;  %v3795_v46 = vld [vmem:[%s4721_s22 + $0xc0] sm:$0xff]  }
0x1238   :  { %3377 = vmatprep.subr.bf16.mxu1 %v3795_v46 }
0x1239   :  { %v2299_v49 = vpack.c.bf16 %v4546_v48, %v4546_v48 }
0x123b   :  { %3159 = vmatmul.mubr.msk.bf16.vlgmr.msra.gmra.mrb[56].mxu0 %vm420_vm3, %v2299_v49  ;;  %v3797_v49 = vld [vmem:[%s4721_s22 + $0xc8] sm:$0xff]  }
0x123c   :  { %3639 = vmatprep.mubr.msk.bf16.mxu0 %vm3852_vm0, %v3851_v1 }
0x130e   :  { %v2390_v52 = vpop.f32.mrb[56].mxu0 }
0x130f   :  { %v2391_v53 = vadd.f32 %v2390_v52, %v2306_v51  ;;  %v2392_v54 = vpop.f32.mrb[57].mxu0  ;;  %v3799_v51 = vld [vmem:[%s4721_s22 + $0xd0] sm:$0xff]  }
0x1310   :  { %v2394_v55 = vpop.f32.mrb[58].mxu0  ;;  %v2393_v60 = vadd.f32 %v2392_v54, %v2310_v58  ;;  %v3800_v52 = vld [vmem:[%s4721_s22 + $0x90] sm:$0xff]   ;;  %v3802_v54 = vld [vmem:[%s4721_s22 + $0x98] sm:$0xff]   ;;  %v3806_v58 = vld [vmem:[%s4721_s22 + $0xa8] sm:$0xff]  }
0x1311   :  { %v2397_v56 = vpack.c.bf16 %v2391_v53, %v2391_v53  ;;  %v2395_v57 = vpop.f32.mrb[59].mxu0  ;;  %v3801_v53 = vld [vmem:[%s4721_s22 + $0xd8] sm:$0xff]   ;;  %v3803_v55 = vld [vmem:[%s4721_s22 + $0xe0] sm:$0xff]  }
0x1312   :  { %v2460_v7 = vpack.c.bf16 %v2393_v60, %v2393_v60  ;;  %v3805_v57 = vld [vmem:[%s4721_s22 + $0xe8] sm:$0xff]  }
0x1313   :  { %2399 = vrot.lane.b32.xlu1 %v2397_v56, %s3854_s29 }
0x1314   :  { %v2465_v61 = vsel %vm1818_vm4, %v2460_v7, 0 }
0x1385   :  { %v2400_v59 = vpop.permute.xlu1 %2399 }
0x1386   :  { %v2405_v18 = vsel %vm420_vm3, %v2400_v59, 0 }
0x1387   :  { %3638 = vmatpush3.bf16.xpose.msra.mxu0 %v2405_v18 }
0x1388   :  { %3643 = vmatprep.subr.bf16.mxu0 %v3851_v1 }
0x138e   :  { %3640 = vmatmul.mubr.msk.bf16.vlgmr.msra.gmra.mrb[60].mxu0 %vm420_vm3, %v2397_v56  ;;  %v3804_v56 = vld [vmem:[%s4721_s22 + $0xa0] sm:$0xff]  }
0x138f   :  { %3644 = vmatpush3.bf16.msra.mxu0 %v2465_v61  ;;  %3645 = vmatprep.mubr.msk.bf16.mxu0 %vm3852_vm0, %v3851_v1  ;;  %v3171_v1 = vld [vmem:[%s4716_s17 + $0x1] ss:$0 sm:$0xff] }
0x1390   :  { %2690 = vmatprep.subr.bf16.mxu0 %v3785_v39  ;;  %v3179_v61 = vld [vmem:[%s4717_s18 + $0x1] ss:$0 sm:$0xff] }
0x1461   :  { %v2441_v62 = vpop.f32.mrb[60].mxu0 }
0x1462   :  { %v2447_v63 = vmul.f32 0.125, %v2441_v62  ;;  %v3641_v0 = vpop.f32.mrb[61].mxu0 }
0x1463   :  { %v2444_v2 = vpop.f32.mrb[62].mxu0 }
0x1464   :  { %v3642_v3 = vpop.f32.mrb[63].mxu0  ;;  %v2448_v4 = vsel %vm1801_vm5, %v2447_v63, -inf }
0x1465   :  { %2449 = vmax.xlane.f32.xlu1 %v2448_v4  ;;  %v3807_v4 = vld [vmem:[%s4721_s22 + $0xf0] sm:$0xff]  }
0x14f2   :  { %v2450_v5 = vpop.xlane.xlu1 %2449 }
0x14f3   :  { %v2451_v6 = vsub.f32 %v2447_v63, %v2450_v5  ;;  %v3180_v63 = vld [vmem:[%s4718_s19 + $0x1] ss:$0 sm:$0xff]  ;;  %v3808_v5 = vld [vmem:[%s4721_s22 + $0xb0] sm:$0xff]  }
0x14f5   :  { %v2452_v8 = vmul.f32 1.442695, %v2451_v6  ;;  %v3809_v6 = vld [vmem:[%s4721_s22 + $0xf8] sm:$0xff]  }
0x14f7   :  { %3819 = vpow2.f32 %v2452_v8  ;;  %v3810_v8 = vld [vmem:[%s4721_s22 + $0xb8] sm:$0xff]  }
0x1501   :  { %v3820_v9 = vpop.eup %3819 }
0x1502   :  { %v2454_v10 = vsel %vm1801_vm5, %v3820_v9, 0.0 }
0x1503   :  { %2455 = vadd.xlane.f32.xlu0 %v2454_v10 }
0x1590   :  { %v2456_v19 = vpop.xlane.xlu0 %2455 }
0x1591   :  { %3821 = vrcp.f32 %v2456_v19 }
0x159b   :  { %v3822_v20 = vpop.eup %3821 }
0x159c   :  { %v2458_v21 = vmul.f32 %v3822_v20, %v3820_v9  ;;  %v3189_v9 = vld [vmem:[%s4720_s21 + $0x2] sm:$0x3] }
0x159d   :  { %v2640_v10 = vrot.slane %v3189_v9, %v4380_v40  ;;  %v2644_v11 = vrot.slane %v3189_v9, %v4387_v47 }
0x159e   :  { %v2459_v22 = vpack.c.bf16 %v2458_v21, %v2458_v21 }
0x15a0   :  { %3646 = vmatmul.mubr.msk.bf16.vlgmr.msra.gmra.mrb[64].mxu0 %vm1801_vm5, %v2459_v22 }
0x15a1   :  { %2722 = vmatprep.mubr.bf16.mxu0 %v3853_v32  ;;  %2691 = vmatpush1.bf16.msra.mxu0 %v3783_v41  ;;  %v3251_v41 = vld [vmem:[%s4723_s24 + $0x1] ss:$0 sm:$0xff] }
0x15a2   :  { %2692 = vmatprep.subr.bf16.mxu0 %v3788_v42 }
0x15a5   :  { %2693 = vmatpush1.bf16.msra.mxu0 %v3786_v43  ;;  %v3252_v43 = vld [vmem:[%s4724_s25 + $0x1] ss:$0 sm:$0xff] }
0x15a6   :  { %2694 = vmatprep.subr.bf16.mxu0 %v3791_v44 }
0x15a9   :  { %2695 = vmatpush1.bf16.msra.mxu0 %v3789_v45 }
0x15aa   :  { %2696 = vmatprep.subr.bf16.mxu0 %v3794_v15 }
0x15ad   :  { %2697 = vmatpush1.bf16.msra.mxu0 %v3792_v14 }
0x1673   :  { %v2501_v13 = vpop.f32.mrb[64].mxu0 }
0x1674   :  { %v2516_v24 = vpack.c.bf16 %v2501_v13, %v2501_v13  ;;  %v3647_v25 = vpop.f32.mrb[65].mxu0 }
0x1675   :  { %v2504_v26 = vpop.f32.mrb[66].mxu0 }
0x1676   :  { %v3648_v27 = vpop.f32.mrb[67].mxu0  ;;  %3658 = vmatmul.mubr.msk.bf16.vlgmr.msra.gmra.mrb[60].mxu1 %vm420_vm3, %v2516_v24 }
0x1677   :  { %v3232_v27 = vld [vmem:[%s4722_s23 + $0x1] ss:$0 sm:$0xff] }
0x1749   :  { %v2586_v28 = vpop.f32.mrb[60].mxu1 }
0x174a   :  { %v2587_v17 = vadd.f32 %v3171_v1, %v2586_v28  ;;  %v3659_v29 = vpop.f32.mrb[61].mxu1 }
0x174b   :  { %v2589_v32 = vpop.f32.mrb[62].mxu1 }
0x174c   :  { %v3660_v30 = vpop.f32.mrb[63].mxu1  ;;  %v2592_v31 = vadd.f32 %v2587_v17, %v4546_v48  ;;  %v3796_v48 = vld [vmem:[%s4721_s22 + $0x80] sm:$0xff]  }
0x174d   :  { %3378 = vmatpush3.bf16.msra.mxu1 %v3796_v48 }
0x174e   :  { %v2597_v33 = vsel %vm420_vm3, %v2592_v31, 0.0  ;;  %3379 = vmatprep.subr.bf16.mxu1 %v3797_v49 }
0x174f   :  { %2598 = vadd.xlane.f32.xlu0 %v2597_v33 }
0x1751   :  { %3380 = vmatpush3.bf16.msra.mxu1 %v3798_v50 }
0x1752   :  { %3381 = vmatprep.subr.bf16.mxu1 %v3799_v51 }
0x1755   :  { %3382 = vmatpush3.bf16.msra.mxu1 %v3800_v52 }
0x1756   :  { %3383 = vmatprep.subr.bf16.mxu1 %v3801_v53 }
0x1759   :  { %3384 = vmatpush3.bf16.msra.mxu1 %v3802_v54 }
0x175a   :  { %3385 = vmatprep.subr.bf16.mxu1 %v3803_v55 }
0x175d   :  { %3386 = vmatpush3.bf16.msra.mxu1 %v3804_v56 }
0x175e   :  { %3387 = vmatprep.subr.bf16.mxu1 %v3805_v57 }
0x1761   :  { %3388 = vmatpush3.bf16.msra.mxu1 %v3806_v58 }
0x1762   :  { %3389 = vmatprep.subr.bf16.mxu1 %v3807_v4 }
0x1765   :  { %3390 = vmatpush3.bf16.msra.mxu1 %v3808_v5 }
0x1766   :  { %3391 = vmatprep.subr.bf16.mxu1 %v3809_v6 }
0x1769   :  { %3392 = vmatpush3.bf16.msra.mxu1 %v3810_v8 }
0x17dc   :  { %v2599_v34 = vpop.xlane.xlu0 %2598 }
0x17dd   :  { %v2600_v35 = vmul.f32 0.015625, %v2599_v34 }
0x17df   :  { %v2601_v36 = vsub.f32 %v2592_v31, %v2600_v35 }
0x17e1   :  { %v2602_v37 = vmul.f32 %v2601_v36, %v2601_v36 }
0x17e3   :  { %v2603_v38 = vsel %vm420_vm3, %v2602_v37, 0.0 }
0x17e4   :  { %2604 = vadd.xlane.f32.xlu0 %v2603_v38 }
0x1871   :  { %v2605_v59 = vpop.xlane.xlu0 %2604 }
0x1872   :  { %v2606_v60 = vmul.f32 0.015625, %v2605_v59 }
0x1874   :  { %v2607_v18 = vadd.f32 1e-05, %v2606_v60 }
0x1876   :  { %3823 = vrsqrt.f32 %v2607_v18 }
0x1880   :  { %v3824_v7 = vpop.eup %3823 }
0x1881   :  { %v2609_v62 = vmul.f32 %v3824_v7, %v2601_v36 }
0x1883   :  { %v2616_v0 = vmul.f32 %v3179_v61, %v2609_v62 }
0x1885   :  { %v2623_v2 = vadd.f32 %v3180_v63, %v2616_v0 }
0x1887   :  { %v2633_v3 = vpack.c.bf16 %v2623_v2, %v2623_v2 }
0x1889   :  { %3198 = vmatmul.mubr.msk.bf16.vlgmr.msra.gmra.mrb[68].mxu0 %vm420_vm3, %v2633_v3 }
0x195c   :  { %v2724_v12 = vpop.f32.mrb[68].mxu0 }
0x195d   :  { %v2725_v16 = vadd.f32 %v2724_v12, %v2640_v10  ;;  %v2726_v19 = vpop.f32.mrb[69].mxu0 }
0x195e   :  { %v2727_v20 = vadd.f32 %v2726_v19, %v2644_v11  ;;  %v2728_v21 = vpop.f32.mrb[70].mxu0 }
0x195f   :  { %v2731_v22 = vmax.f32 %v2725_v16, 0.0  ;;  %v2729_v23 = vpop.f32.mrb[71].mxu0 }
0x1960   :  { %v2732_v13 = vmax.f32 %v2727_v20, 0.0 }
0x1961   :  { %v2766_v25 = vpack.c.bf16 %v2731_v22, %v2731_v22 }
0x1962   :  { %v2767_v24 = vpack.c.bf16 %v2732_v13, %v2732_v13 }
0x1964   :  { %2904 = vmatprep.mubr.bf16.mxu1 %v2767_v24 }
0x1965   :  { %2905 = vmatmul.mubr.bf16.vlgmr.msra.gmra.mrb[64].mxu1 %v2766_v25 }
0x1a38   :  { %v3393_v26 = vpop.f32.mrb[64].mxu1 }
0x1a39   :  { %v3394_v40 = vpop.f32.mrb[65].mxu1 }
0x1a3a   :  { %v3395_v1 = vadd.f32 %v3394_v40, %v3393_v26  ;;  %v3396_v47 = vpop.f32.mrb[66].mxu1 }
0x1a3b   :  { %v3397_v28 = vpop.f32.mrb[67].mxu1 }
0x1a3c   :  { %v2907_v17 = vadd.f32 %v3395_v1, %v3232_v27 }
0x1a3e   :  { %v2912_v29 = vadd.f32 %v2907_v17, %v2623_v2 }
0x1a40   :  { %v2917_v32 = vsel %vm420_vm3, %v2912_v29, 0.0 }
0x1a41   :  { %2918 = vadd.xlane.f32.xlu0 %v2917_v32 }
0x1ace   :  { %v2919_v30 = vpop.xlane.xlu0 %2918 }
0x1acf   :  { %v2920_v31 = vmul.f32 0.015625, %v2919_v30 }
0x1ad1   :  { %v2921_v33 = vsub.f32 %v2912_v29, %v2920_v31 }
0x1ad3   :  { %v2922_v34 = vmul.f32 %v2921_v33, %v2921_v33 }
0x1ad5   :  { %v2923_v35 = vsel %vm420_vm3, %v2922_v34, 0.0 }
0x1ad6   :  { %2924 = vadd.xlane.f32.xlu0 %v2923_v35 }
0x1b63   :  { %v2925_v36 = vpop.xlane.xlu0 %2924 }
0x1b64   :  { %v2926_v37 = vmul.f32 0.015625, %v2925_v36 }
0x1b66   :  { %v2927_v38 = vadd.f32 1e-05, %v2926_v37 }
0x1b68   :  { %3825 = vrsqrt.f32 %v2927_v38 }
0x1b72   :  { %v3826_v39 = vpop.eup %3825 }
0x1b73   :  { %v2929_v42 = vmul.f32 %v3826_v39, %v2921_v33 }
0x1b75   :  { %v2936_v44 = vmul.f32 %v3251_v41, %v2929_v42 }
0x1b77   :  { %v2943_v45 = vadd.f32 %v3252_v43, %v2936_v44 }
0x1b79   :  { %2944 = vst.msk [vmem:[#allocation2] sm:$0xff] %vm420_vm3, %v2943_v45 }
0x1b7a   :  { %3838 = shalt.err (!%p3835_p4)
}
0x1b7b   :  { %s3839_s29 = scalar_lea.hbm %s4725_s26, 128 }
0x1b7c   :  { %p3840_p5 = scmp.ne.s32.totalorder %s4725_s26, %s3839_s29  ;;  %p3843_p6 = scmp.lt.u32.totalorder %s3839_s29, %s4725_s26 }
0x1b7e   :  { %p3845_p7 = pnand %p3843_p6, %p3840_p5 }
0x1b80   :  { %3848 = shalt.err (!%p3845_p7)
}
0x1b81   :  { %2954 = dma.vmem_to_hbm [thread:$0]  %s2952_s14, 128, %s4725_s26, [#allocation3]  }
0x1b82   :  { %3849 = dma.done.wait [#allocation3], 128  }
0x1b83   :  { %3850 = vsyncadd [#allocation3], 4294967168 }
0x1b84   :  { %2958 = vsyncpa [#allocation3], 1 }

</bundles_post_ra>
